<compile_context>
chip_gen: v6e
topology: v6e:2x2x1
jax: 0.10.0
libtpu: 0.0.40
codegen_flags: <defaults>
</compile_context>

<pallas_src>
import functools

import jax
import jax.numpy as jnp
from jax.experimental import pallas as pl
from jax.experimental.pallas import tpu as pltpu


def _attention_lg_kernel(offsets, hw, halo, bn,
                         x_ref, m_ref, wbig_ref, wlint_ref, b2_ref,
                         out_ref, xs_ref):
    # x_ref    : (bn, C, HW) f32   input activations, channel-major per image
    # m_ref    : (8, bn*HW)  f32   validity masks for the 8 non-center taps
    # wbig_ref : (2C, 9C+1)  bf16  fused conv+pool+gconv weights (+ bias column)
    # wlint_ref: (C, 2C)     bf16  final 1x1 weights with BN3 scale folded in
    # b2_ref   : (C, 1)      f32   final BN shift
    # out_ref  : (bn, C, HW) f32
    # xs_ref   : (C, bn*HW + 2*halo) f32 scratch: the bn images laid side-by-side
    #            on the lane axis with a zero halo so every 3x3 tap is an
    #            in-bounds static slice (cross-image / wrap lanes are masked).
    c = out_ref.shape[1]
    bhw = bn * hw

    # In-VMEM halo pad (replaces the old wrapper-side HBM pad pass).
    xs_ref[:, :halo] = jnp.zeros((c, halo), xs_ref.dtype)
    xs_ref[:, halo + bhw:] = jnp.zeros((c, halo), xs_ref.dtype)
    for b in range(bn):
        xs_ref[:, halo + b * hw:halo + (b + 1) * hw] = x_ref[b]

    # im2col slab (9C+1, bn*HW): 9 shifted taps (masked, cast to bf16 per tap)
    # plus a ones-row that carries the folded biases through the fused matmul.
    taps = []
    mi = 0
    for k, off in enumerate(offsets):
        patch = xs_ref[:, pl.ds(halo + off, bhw)]                   # (C, bn*HW) f32
        if k == 4:                                                  # center tap: always valid
            taps.append(patch.astype(jnp.bfloat16))
        else:
            taps.append((patch * m_ref[mi:mi + 1, :]).astype(jnp.bfloat16))
            mi += 1
    taps.append(jnp.ones((1, bhw), jnp.bfloat16))
    stacked = jnp.concatenate(taps, axis=0)                         # (9C+1, bn*HW)

    # One MXU pass:
    #   rows [0:C)  -> BN1(Conv3x3(x))            (pre-ReLU)
    #   rows [C:2C) -> Conv1x1(BN2(AvgPool3x3(x))) (pre-ReLU)
    big = jnp.dot(wbig_ref[...], stacked,
                  preferred_element_type=jnp.float32)               # (2C, bn*HW)

    # hconv input: ReLU(cat([l, g])) == ReLU(big) (halves already in cat order).
    lg = jnp.maximum(big, 0.0).astype(jnp.bfloat16)
    h = jnp.dot(wlint_ref[...], lg,
                preferred_element_type=jnp.float32)                 # (C, bn*HW), BN3 scale folded

    # out = x * h + BN3 shift ; per-image lane-dense stores (HW multiple of 128).
    b2 = b2_ref[...]
    for b in range(bn):
        out_ref[b] = x_ref[b] * h[:, b * hw:(b + 1) * hw] + b2


def prepare_params(w3, wg, wlin, bn_scale, bn_shift, h, w):
    """One-time weight folding (f32) + bf16 cast, hoisted out of the jitted forward.

    w3: (9, Cin, Cout) 3x3 conv taps, wg: (Cin, Cout) gconv 1x1,
    wlin: (2Cin, Cout) final 1x1, bn_scale/bn_shift: (3, C) folded BN params
    for [lconv BN1, gconv BN2, final BN3].
    """
    c = wg.shape[0]
    s0, s1, s2 = bn_scale[0], bn_scale[1], bn_scale[2]
    b0, b1, b2 = bn_shift[0], bn_shift[1], bn_shift[2]

    # rows [0:C): im2col 3x3 conv weights, BN1 scale folded per output row.
    wtop = jnp.concatenate([w3[k].T for k in range(9)], axis=1) * s0[:, None]   # (C, 9C)
    # rows [C:2C): gconv(BN2(avgpool(x))) == (Wg^T · diag(s1) / 9) on every tap.
    gblk = (wg.T * s1[None, :]) / 9.0                                           # (C, C)
    wbot = jnp.tile(gblk, (1, 9))                                               # (C, 9C)
    # bias column, consumed by the ones-row of the im2col slab.
    bias_col = jnp.concatenate([b0, wg.T @ b1])[:, None]                        # (2C, 1)
    wbig = jnp.concatenate([jnp.concatenate([wtop, wbot], axis=0), bias_col],
                           axis=1)                                              # (2C, 9C+1)
    # Final 1x1 with the BN3 scale folded per output row.
    wlint = wlin.T * s2[:, None]                                                # (C, 2C)

    # Per-tap validity masks (8 non-center taps): zero out-of-image / row-wrap /
    # cross-image lanes of the shifted flat-spatial slices.
    rows = jnp.arange(h)[:, None]
    cols = jnp.arange(w)[None, :]
    masks = []
    for kh in range(3):
        for kw in range(3):
            if (kh, kw) == (1, 1):
                continue
            dh, dw = kh - 1, kw - 1
            valid = ((rows + dh >= 0) & (rows + dh < h) &
                     (cols + dw >= 0) & (cols + dw < w))
            masks.append(valid.reshape(h * w))
    mask = jnp.stack(masks).astype(jnp.float32)                                 # (8, HW)

    return {
        "wbig": wbig.astype(jnp.bfloat16),        # fold in f32, cast once
        "wlint": wlint.astype(jnp.bfloat16),
        "b2": b2[:, None].astype(jnp.float32),    # (C, 1)
        "mask": mask,
    }


def _pick_block_n(n):
    """Largest images-per-step in {2,4,8,16} dividing n while keeping >=2 grid
    steps (so both v7x TensorCores get work); falls back to 1."""
    best = 1
    for b in (2, 4, 8, 16):
        if n % b == 0 and n // b >= 2:
            best = b
    return best


@jax.jit
def attention_lg_forward(x_nchw, params):
    """x_nchw: (N, C, H, W) float32; params from prepare_params. Returns (N, C, H, W)."""
    n, c, h, w = x_nchw.shape
    hw = h * w
    bn = _pick_block_n(n)
    halo = ((w + 1 + 127) // 128) * 128     # >= w+1 and keeps image copies lane-aligned

    x_flat = x_nchw.reshape(n, c, hw)       # pure reshape: no transpose / pad HBM pass
    mask_t = jnp.tile(params["mask"], (1, bn))                       # (8, bn*HW)

    offsets = tuple(dh * w + dw for dh in (-1, 0, 1) for dw in (-1, 0, 1))
    kernel = functools.partial(_attention_lg_kernel, offsets, hw, halo, bn)

    flops = (2 * (2 * c) * (9 * c + 1) + 2 * c * (2 * c) + 6 * c) * (n * hw)
    bytes_accessed = ((2 * x_flat.size + mask_t.size + 3 * c) * 4
                      + 2 * (params["wbig"].size + params["wlint"].size))
    cost = pl.CostEstimate(flops=int(flops), transcendentals=0,
                           bytes_accessed=int(bytes_accessed))

    out_flat = pl.pallas_call(
        kernel,
        out_shape=jax.ShapeDtypeStruct((n, c, hw), jnp.float32),
        grid=(n // bn,),
        in_specs=[
            pl.BlockSpec((bn, c, hw), lambda i: (i, 0, 0)),
            pl.BlockSpec((8, bn * hw), lambda i: (0, 0)),
            pl.BlockSpec((2 * c, 9 * c + 1), lambda i: (0, 0)),
            pl.BlockSpec((c, 2 * c), lambda i: (0, 0)),
            pl.BlockSpec((c, 1), lambda i: (0, 0)),
        ],
        out_specs=pl.BlockSpec((bn, c, hw), lambda i: (i, 0, 0)),
        scratch_shapes=[pltpu.VMEM((c, bn * hw + 2 * halo), jnp.float32)],
        compiler_params=pltpu.CompilerParams(
            dimension_semantics=("parallel",),
            vmem_limit_bytes=32 * 1024 * 1024),
        cost_estimate=cost,
    )(x_flat, mask_t, params["wbig"], params["wlint"], params["b2"])

    return out_flat.reshape(n, c, h, w)                              # still NCHW


def reference(x_nchw, w3, wg, wlin, bn_scale, bn_shift):
    """Pure-JAX f32 reference with identical semantics (for verification)."""
    n, c, h, w = x_nchw.shape
    x = jnp.transpose(x_nchw, (0, 2, 3, 1))
    xpad = jnp.pad(x, ((0, 0), (1, 1), (1, 1), (0, 0)))
    lacc = jnp.zeros_like(x)
    pacc = jnp.zeros_like(x)
    for kh in range(3):
        for kw in range(3):
            patch = xpad[:, kh:kh + h, kw:kw + w, :]
            lacc = lacc + jnp.einsum('nhwc,cd->nhwd', patch, w3[kh * 3 + kw])
            pacc = pacc + patch
    pool = pacc / 9.0                                   # count_include_pad=True
    l = jax.nn.relu(lacc * bn_scale[0] + bn_shift[0])
    g = pool * bn_scale[1] + bn_shift[1]
    g = jax.nn.relu(jnp.einsum('nhwc,cd->nhwd', g, wg))
    hcat = jax.nn.relu(jnp.concatenate([l, g], axis=-1))
    hconv = jnp.einsum('nhwc,cd->nhwd', hcat, wlin)
    out = (x * hconv) * bn_scale[2] + bn_shift[2]
    return jnp.transpose(out, (0, 3, 1, 2))


if __name__ == "__main__":
    key = jax.random.PRNGKey(0)
    N, DIM, H, W = 8, 8, 16, 16       # N=8 -> block of 4 images/step, grid=(2,)
    EPS = 1e-6

    keys = jax.random.split(key, 8)
    x = jax.random.normal(keys[0], (N, DIM, H, W), jnp.float32)

    # Conv weights (stored as (taps, Cin, Cout) / (Cin, Cout) / (2Cin, Cout)).
    w3 = 0.1 * jax.random.normal(keys[1], (9, DIM, DIM), jnp.float32)
    wg = 0.1 * jax.random.normal(keys[2], (DIM, DIM), jnp.float32)
    wlin = 0.1 * jax.random.normal(keys[3], (2 * DIM, DIM), jnp.float32)

    # Inference-mode BatchNorm params for [lconv BN1, gconv BN2, final BN3],
    # pre-folded into per-channel scale/shift.
    gamma = 1.0 + 0.1 * jax.random.normal(keys[4], (3, DIM), jnp.float32)
    beta = 0.05 * jax.random.normal(keys[5], (3, DIM), jnp.float32)
    r_mean = 0.1 * jax.random.normal(keys[6], (3, DIM), jnp.float32)
    r_var = 0.5 + jax.random.uniform(keys[7], (3, DIM), jnp.float32)
    bn_scale = gamma / jnp.sqrt(r_var + EPS)
    bn_shift = beta - r_mean * bn_scale

    params = prepare_params(w3, wg, wlin, bn_scale, bn_shift, H, W)   # once, outside jit
    out = attention_lg_forward(x, params)
    out = jax.block_until_ready(out)

    ref = reference(x, w3, wg, wlin, bn_scale, bn_shift)
    assert out.shape == (N, DIM, H, W)
    # bf16 MXU operands (incl. folded BN scales) with f32 accumulation vs a
    # pure-f32 reference -> loosened tolerance.
    err = float(jnp.max(jnp.abs(out - ref)))
    assert jnp.allclose(out, ref, atol=5e-2, rtol=5e-2), err

    print("KERNEL_OK")
</pallas_src>

<mosaic_0001>
module attributes {stable_mosaic.version = 11 : i64} {
  func.func @_attention_lg_kernel(%arg0: i32, %arg1: memref<4x8x256xf32, #tpu.memory_space<vmem>>, %arg2: memref<8x1024xf32, #tpu.memory_space<vmem>>, %arg3: memref<16x73xbf16, #tpu.memory_space<vmem>>, %arg4: memref<8x16xbf16, #tpu.memory_space<vmem>>, %arg5: memref<8x1xf32, #tpu.memory_space<vmem>>, %arg6: memref<4x8x256xf32, #tpu.memory_space<vmem>>, %arg7: memref<8x1280xf32, #tpu.memory_space<vmem>>) attributes {dimension_semantics = [#tpu.dimension_semantics<parallel>], iteration_bounds = array<i64: 2>, scalar_prefetch = 0 : i64, scratch_operands = 1 : i64, tpu.core_type = #tpu.core_type<tc>, window_params = [{transform_indices = @transform_0, window_bounds = array<i64: 4, 8, 256>}, {pipeline_mode = #tpu.pipeline_mode<synchronous>, transform_indices = @transform_1, window_bounds = array<i64: 8, 1024>}, {pipeline_mode = #tpu.pipeline_mode<synchronous>, transform_indices = @transform_2, window_bounds = array<i64: 16, 73>}, {pipeline_mode = #tpu.pipeline_mode<synchronous>, transform_indices = @transform_3, window_bounds = array<i64: 8, 16>}, {pipeline_mode = #tpu.pipeline_mode<synchronous>, transform_indices = @transform_4, window_bounds = array<i64: 8, 1>}, {transform_indices = @transform_5, window_bounds = array<i64: 4, 8, 256>}]} {
    %cst = arith.constant 0.000000e+00 : f32
    %0 = vector.broadcast %cst : f32 to vector<8x128xf32>
    %c0 = arith.constant 0 : index
    %c0_0 = arith.constant 0 : index
    %1 = vector.load %arg7[%c0, %c0_0] : memref<8x1280xf32, #tpu.memory_space<vmem>>, vector<8x128xf32>
    tpu.vector_store %arg7[%c0, %c0_0], %0 {strides = array<i32>} : memref<8x1280xf32, #tpu.memory_space<vmem>>, vector<8x128xf32>,
    %cst_1 = arith.constant 0.000000e+00 : f32
    %2 = vector.broadcast %cst_1 : f32 to vector<8x128xf32>
    %c0_2 = arith.constant 0 : index
    %c1152 = arith.constant 1152 : index
    %3 = vector.load %arg7[%c0_2, %c1152] : memref<8x1280xf32, #tpu.memory_space<vmem>>, vector<8x128xf32>
    tpu.vector_store %arg7[%c0_2, %c1152], %2 {strides = array<i32>} : memref<8x1280xf32, #tpu.memory_space<vmem>>, vector<8x128xf32>,
    %c0_3 = arith.constant 0 : index
    %c0_4 = arith.constant 0 : index
    %c0_5 = arith.constant 0 : index
    %4 = vector.load %arg1[%c0_3, %c0_4, %c0_5] : memref<4x8x256xf32, #tpu.memory_space<vmem>>, vector<1x8x256xf32>
    %5 = vector.shape_cast %4 : vector<1x8x256xf32> to vector<8x256xf32>
    %c0_6 = arith.constant 0 : index
    %c128 = arith.constant 128 : index
    %6 = vector.load %arg7[%c0_6, %c128] : memref<8x1280xf32, #tpu.memory_space<vmem>>, vector<8x256xf32>
    tpu.vector_store %arg7[%c0_6, %c128], %5 {strides = array<i32>} : memref<8x1280xf32, #tpu.memory_space<vmem>>, vector<8x256xf32>,
    %c1 = arith.constant 1 : index
    %c0_7 = arith.constant 0 : index
    %c0_8 = arith.constant 0 : index
    %7 = vector.load %arg1[%c1, %c0_7, %c0_8] : memref<4x8x256xf32, #tpu.memory_space<vmem>>, vector<1x8x256xf32>
    %8 = vector.shape_cast %7 : vector<1x8x256xf32> to vector<8x256xf32>
    %c0_9 = arith.constant 0 : index
    %c384 = arith.constant 384 : index
    %9 = vector.load %arg7[%c0_9, %c384] : memref<8x1280xf32, #tpu.memory_space<vmem>>, vector<8x256xf32>
    tpu.vector_store %arg7[%c0_9, %c384], %8 {strides = array<i32>} : memref<8x1280xf32, #tpu.memory_space<vmem>>, vector<8x256xf32>,
    %c2 = arith.constant 2 : index
    %c0_10 = arith.constant 0 : index
    %c0_11 = arith.constant 0 : index
    %10 = vector.load %arg1[%c2, %c0_10, %c0_11] : memref<4x8x256xf32, #tpu.memory_space<vmem>>, vector<1x8x256xf32>
    %11 = vector.shape_cast %10 : vector<1x8x256xf32> to vector<8x256xf32>
    %c0_12 = arith.constant 0 : index
    %c640 = arith.constant 640 : index
    %12 = vector.load %arg7[%c0_12, %c640] : memref<8x1280xf32, #tpu.memory_space<vmem>>, vector<8x256xf32>
    tpu.vector_store %arg7[%c0_12, %c640], %11 {strides = array<i32>} : memref<8x1280xf32, #tpu.memory_space<vmem>>, vector<8x256xf32>,
    %c3 = arith.constant 3 : index
    %c0_13 = arith.constant 0 : index
    %c0_14 = arith.constant 0 : index
    %13 = vector.load %arg1[%c3, %c0_13, %c0_14] : memref<4x8x256xf32, #tpu.memory_space<vmem>>, vector<1x8x256xf32>
    %14 = vector.shape_cast %13 : vector<1x8x256xf32> to vector<8x256xf32>
    %c0_15 = arith.constant 0 : index
    %c896 = arith.constant 896 : index
    %15 = vector.load %arg7[%c0_15, %c896] : memref<8x1280xf32, #tpu.memory_space<vmem>>, vector<8x256xf32>
    tpu.vector_store %arg7[%c0_15, %c896], %14 {strides = array<i32>} : memref<8x1280xf32, #tpu.memory_space<vmem>>, vector<8x256xf32>,
    %c0_16 = arith.constant 0 : index
    %c111 = arith.constant 111 : index
    %16 = vector.load %arg7[%c0_16, %c111] : memref<8x1280xf32, #tpu.memory_space<vmem>>, vector<8x1024xf32>
    %c0_17 = arith.constant 0 : index
    %c0_18 = arith.constant 0 : index
    %17 = vector.load %arg2[%c0_17, %c0_18] : memref<8x1024xf32, #tpu.memory_space<vmem>>, vector<1x1024xf32>
    %18 = vector.broadcast %17 : vector<1x1024xf32> to vector<8x1024xf32>
    %19 = arith.mulf %16, %18 : vector<8x1024xf32>
    %20 = arith.truncf %19 : vector<8x1024xf32> to vector<8x1024xbf16>
    %c0_19 = arith.constant 0 : index
    %c112 = arith.constant 112 : index
    %21 = vector.load %arg7[%c0_19, %c112] : memref<8x1280xf32, #tpu.memory_space<vmem>>, vector<8x1024xf32>
    %c1_20 = arith.constant 1 : index
    %c0_21 = arith.constant 0 : index
    %22 = vector.load %arg2[%c1_20, %c0_21] : memref<8x1024xf32, #tpu.memory_space<vmem>>, vector<1x1024xf32>
    %23 = vector.broadcast %22 : vector<1x1024xf32> to vector<8x1024xf32>
    %24 = arith.mulf %21, %23 : vector<8x1024xf32>
    %25 = arith.truncf %24 : vector<8x1024xf32> to vector<8x1024xbf16>
    %c0_22 = arith.constant 0 : index
    %c113 = arith.constant 113 : index
    %26 = vector.load %arg7[%c0_22, %c113] : memref<8x1280xf32, #tpu.memory_space<vmem>>, vector<8x1024xf32>
    %c2_23 = arith.constant 2 : index
    %c0_24 = arith.constant 0 : index
    %27 = vector.load %arg2[%c2_23, %c0_24] : memref<8x1024xf32, #tpu.memory_space<vmem>>, vector<1x1024xf32>
    %28 = vector.broadcast %27 : vector<1x1024xf32> to vector<8x1024xf32>
    %29 = arith.mulf %26, %28 : vector<8x1024xf32>
    %30 = arith.truncf %29 : vector<8x1024xf32> to vector<8x1024xbf16>
    %c0_25 = arith.constant 0 : index
    %c127 = arith.constant 127 : index
    %31 = vector.load %arg7[%c0_25, %c127] : memref<8x1280xf32, #tpu.memory_space<vmem>>, vector<8x1024xf32>
    %c3_26 = arith.constant 3 : index
    %c0_27 = arith.constant 0 : index
    %32 = vector.load %arg2[%c3_26, %c0_27] : memref<8x1024xf32, #tpu.memory_space<vmem>>, vector<1x1024xf32>
    %33 = vector.broadcast %32 : vector<1x1024xf32> to vector<8x1024xf32>
    %34 = arith.mulf %31, %33 : vector<8x1024xf32>
    %35 = arith.truncf %34 : vector<8x1024xf32> to vector<8x1024xbf16>
    %c0_28 = arith.constant 0 : index
    %c128_29 = arith.constant 128 : index
    %36 = vector.load %arg7[%c0_28, %c128_29] : memref<8x1280xf32, #tpu.memory_space<vmem>>, vector<8x1024xf32>
    %37 = arith.truncf %36 : vector<8x1024xf32> to vector<8x1024xbf16>
    %c0_30 = arith.constant 0 : index
    %c129 = arith.constant 129 : index
    %38 = vector.load %arg7[%c0_30, %c129] : memref<8x1280xf32, #tpu.memory_space<vmem>>, vector<8x1024xf32>
    %c4 = arith.constant 4 : index
    %c0_31 = arith.constant 0 : index
    %39 = vector.load %arg2[%c4, %c0_31] : memref<8x1024xf32, #tpu.memory_space<vmem>>, vector<1x1024xf32>
    %40 = vector.broadcast %39 : vector<1x1024xf32> to vector<8x1024xf32>
    %41 = arith.mulf %38, %40 : vector<8x1024xf32>
    %42 = arith.truncf %41 : vector<8x1024xf32> to vector<8x1024xbf16>
    %c0_32 = arith.constant 0 : index
    %c143 = arith.constant 143 : index
    %43 = vector.load %arg7[%c0_32, %c143] : memref<8x1280xf32, #tpu.memory_space<vmem>>, vector<8x1024xf32>
    %c5 = arith.constant 5 : index
    %c0_33 = arith.constant 0 : index
    %44 = vector.load %arg2[%c5, %c0_33] : memref<8x1024xf32, #tpu.memory_space<vmem>>, vector<1x1024xf32>
    %45 = vector.broadcast %44 : vector<1x1024xf32> to vector<8x1024xf32>
    %46 = arith.mulf %43, %45 : vector<8x1024xf32>
    %47 = arith.truncf %46 : vector<8x1024xf32> to vector<8x1024xbf16>
    %c0_34 = arith.constant 0 : index
    %c144 = arith.constant 144 : index
    %48 = vector.load %arg7[%c0_34, %c144] : memref<8x1280xf32, #tpu.memory_space<vmem>>, vector<8x1024xf32>
    %c6 = arith.constant 6 : index
    %c0_35 = arith.constant 0 : index
    %49 = vector.load %arg2[%c6, %c0_35] : memref<8x1024xf32, #tpu.memory_space<vmem>>, vector<1x1024xf32>
    %50 = vector.broadcast %49 : vector<1x1024xf32> to vector<8x1024xf32>
    %51 = arith.mulf %48, %50 : vector<8x1024xf32>
    %52 = arith.truncf %51 : vector<8x1024xf32> to vector<8x1024xbf16>
    %c0_36 = arith.constant 0 : index
    %c145 = arith.constant 145 : index
    %53 = vector.load %arg7[%c0_36, %c145] : memref<8x1280xf32, #tpu.memory_space<vmem>>, vector<8x1024xf32>
    %c7 = arith.constant 7 : index
    %c0_37 = arith.constant 0 : index
    %54 = vector.load %arg2[%c7, %c0_37] : memref<8x1024xf32, #tpu.memory_space<vmem>>, vector<1x1024xf32>
    %55 = vector.broadcast %54 : vector<1x1024xf32> to vector<8x1024xf32>
    %56 = arith.mulf %53, %55 : vector<8x1024xf32>
    %57 = arith.truncf %56 : vector<8x1024xf32> to vector<8x1024xbf16>
    %cst_38 = arith.constant 1.000000e+00 : bf16
    %58 = vector.broadcast %cst_38 : bf16 to vector<1x1024xbf16>
    %59 = tpu.concatenate %20, %25, %30, %35, %37, %42, %47, %52, %57, %58 in 0 : vector<8x1024xbf16>, vector<8x1024xbf16>, vector<8x1024xbf16>, vector<8x1024xbf16>, vector<8x1024xbf16>, vector<8x1024xbf16>, vector<8x1024xbf16>, vector<8x1024xbf16>, vector<8x1024xbf16>, vector<1x1024xbf16> -> vector<73x1024xbf16>
    %c0_39 = arith.constant 0 : index
    %c0_40 = arith.constant 0 : index
    %60 = vector.load %arg3[%c0_39, %c0_40] : memref<16x73xbf16, #tpu.memory_space<vmem>>, vector<16x73xbf16>
    %cst_41 = arith.constant dense<0.000000e+00> : vector<16x1024xf32>
    %61 = tpu.matmul %60, %59, %cst_41 {dimension_numbers = #tpu.dot_dimension_numbers<[1], [0], [0], [1], [0, 0, 1, 1], [], []>} : vector<16x73xbf16>, vector<73x1024xbf16>, vector<16x1024xf32> -> vector<16x1024xf32>
    %cst_42 = arith.constant 0.000000e+00 : f32
    %62 = vector.broadcast %cst_42 : f32 to vector<16x1024xf32>
    %63 = arith.maximumf %61, %62 : vector<16x1024xf32>
    %64 = arith.truncf %63 : vector<16x1024xf32> to vector<16x1024xbf16>
    %c0_43 = arith.constant 0 : index
    %c0_44 = arith.constant 0 : index
    %65 = vector.load %arg4[%c0_43, %c0_44] : memref<8x16xbf16, #tpu.memory_space<vmem>>, vector<8x16xbf16>
    %cst_45 = arith.constant dense<0.000000e+00> : vector<8x1024xf32>
    %66 = tpu.matmul %65, %64, %cst_45 {dimension_numbers = #tpu.dot_dimension_numbers<[1], [0], [0], [1], [0, 0, 1, 1], [], []>} : vector<8x16xbf16>, vector<16x1024xbf16>, vector<8x1024xf32> -> vector<8x1024xf32>
    %c0_46 = arith.constant 0 : index
    %c0_47 = arith.constant 0 : index
    %67 = vector.load %arg5[%c0_46, %c0_47] : memref<8x1xf32, #tpu.memory_space<vmem>>, vector<8x1xf32>
    %c0_48 = arith.constant 0 : index
    %c0_49 = arith.constant 0 : index
    %c0_50 = arith.constant 0 : index
    %68 = vector.load %arg1[%c0_48, %c0_49, %c0_50] : memref<4x8x256xf32, #tpu.memory_space<vmem>>, vector<1x8x256xf32>
    %69 = vector.shape_cast %68 : vector<1x8x256xf32> to vector<8x256xf32>
    %70 = vector.extract_strided_slice %66 {offsets = [0, 0], sizes = [8, 256], strides = [1, 1]} : vector<8x1024xf32> to vector<8x256xf32>
    %71 = arith.mulf %69, %70 : vector<8x256xf32>
    %72 = vector.broadcast %67 : vector<8x1xf32> to vector<8x256xf32>
    %73 = arith.addf %71, %72 : vector<8x256xf32>
    %c0_51 = arith.constant 0 : index
    %c0_52 = arith.constant 0 : index
    %c0_53 = arith.constant 0 : index
    %74 = vector.load %arg6[%c0_51, %c0_52, %c0_53] : memref<4x8x256xf32, #tpu.memory_space<vmem>>, vector<1x8x256xf32>
    %75 = vector.shape_cast %74 : vector<1x8x256xf32> to vector<8x256xf32>
    %76 = vector.shape_cast %73 : vector<8x256xf32> to vector<1x8x256xf32>
    tpu.vector_store %arg6[%c0_51, %c0_52, %c0_53], %76 {strides = array<i32>} : memref<4x8x256xf32, #tpu.memory_space<vmem>>, vector<1x8x256xf32>,
    %c1_54 = arith.constant 1 : index
    %c0_55 = arith.constant 0 : index
    %c0_56 = arith.constant 0 : index
    %77 = vector.load %arg1[%c1_54, %c0_55, %c0_56] : memref<4x8x256xf32, #tpu.memory_space<vmem>>, vector<1x8x256xf32>
    %78 = vector.shape_cast %77 : vector<1x8x256xf32> to vector<8x256xf32>
    %79 = vector.extract_strided_slice %66 {offsets = [0, 256], sizes = [8, 256], strides = [1, 1]} : vector<8x1024xf32> to vector<8x256xf32>
    %80 = arith.mulf %78, %79 : vector<8x256xf32>
    %81 = vector.broadcast %67 : vector<8x1xf32> to vector<8x256xf32>
    %82 = arith.addf %80, %81 : vector<8x256xf32>
    %c1_57 = arith.constant 1 : index
    %c0_58 = arith.constant 0 : index
    %c0_59 = arith.constant 0 : index
    %83 = vector.load %arg6[%c1_57, %c0_58, %c0_59] : memref<4x8x256xf32, #tpu.memory_space<vmem>>, vector<1x8x256xf32>
    %84 = vector.shape_cast %83 : vector<1x8x256xf32> to vector<8x256xf32>
    %85 = vector.shape_cast %82 : vector<8x256xf32> to vector<1x8x256xf32>
    tpu.vector_store %arg6[%c1_57, %c0_58, %c0_59], %85 {strides = array<i32>} : memref<4x8x256xf32, #tpu.memory_space<vmem>>, vector<1x8x256xf32>,
    %c2_60 = arith.constant 2 : index
    %c0_61 = arith.constant 0 : index
    %c0_62 = arith.constant 0 : index
    %86 = vector.load %arg1[%c2_60, %c0_61, %c0_62] : memref<4x8x256xf32, #tpu.memory_space<vmem>>, vector<1x8x256xf32>
    %87 = vector.shape_cast %86 : vector<1x8x256xf32> to vector<8x256xf32>
    %88 = vector.extract_strided_slice %66 {offsets = [0, 512], sizes = [8, 256], strides = [1, 1]} : vector<8x1024xf32> to vector<8x256xf32>
    %89 = arith.mulf %87, %88 : vector<8x256xf32>
    %90 = vector.broadcast %67 : vector<8x1xf32> to vector<8x256xf32>
    %91 = arith.addf %89, %90 : vector<8x256xf32>
    %c2_63 = arith.constant 2 : index
    %c0_64 = arith.constant 0 : index
    %c0_65 = arith.constant 0 : index
    %92 = vector.load %arg6[%c2_63, %c0_64, %c0_65] : memref<4x8x256xf32, #tpu.memory_space<vmem>>, vector<1x8x256xf32>
    %93 = vector.shape_cast %92 : vector<1x8x256xf32> to vector<8x256xf32>
    %94 = vector.shape_cast %91 : vector<8x256xf32> to vector<1x8x256xf32>
    tpu.vector_store %arg6[%c2_63, %c0_64, %c0_65], %94 {strides = array<i32>} : memref<4x8x256xf32, #tpu.memory_space<vmem>>, vector<1x8x256xf32>,
    %c3_66 = arith.constant 3 : index
    %c0_67 = arith.constant 0 : index
    %c0_68 = arith.constant 0 : index
    %95 = vector.load %arg1[%c3_66, %c0_67, %c0_68] : memref<4x8x256xf32, #tpu.memory_space<vmem>>, vector<1x8x256xf32>
    %96 = vector.shape_cast %95 : vector<1x8x256xf32> to vector<8x256xf32>
    %97 = vector.extract_strided_slice %66 {offsets = [0, 768], sizes = [8, 256], strides = [1, 1]} : vector<8x1024xf32> to vector<8x256xf32>
    %98 = arith.mulf %96, %97 : vector<8x256xf32>
    %99 = vector.broadcast %67 : vector<8x1xf32> to vector<8x256xf32>
    %100 = arith.addf %98, %99 : vector<8x256xf32>
    %c3_69 = arith.constant 3 : index
    %c0_70 = arith.constant 0 : index
    %c0_71 = arith.constant 0 : index
    %101 = vector.load %arg6[%c3_69, %c0_70, %c0_71] : memref<4x8x256xf32, #tpu.memory_space<vmem>>, vector<1x8x256xf32>
    %102 = vector.shape_cast %101 : vector<1x8x256xf32> to vector<8x256xf32>
    %103 = vector.shape_cast %100 : vector<8x256xf32> to vector<1x8x256xf32>
    tpu.vector_store %arg6[%c3_69, %c0_70, %c0_71], %103 {strides = array<i32>} : memref<4x8x256xf32, #tpu.memory_space<vmem>>, vector<1x8x256xf32>,
    return
  }
  func.func @transform_0(%arg0: i32) -> (i32, i32, i32) {
    %c0_i32 = arith.constant 0 : i32
    %c0_i32_0 = arith.constant 0 : i32
    %c0_i32_1 = arith.constant 0 : i32
    return %arg0, %c0_i32, %c0_i32_0 : i32, i32, i32
  }
  func.func @transform_1(%arg0: i32) -> (i32, i32) {
    %c0_i32 = arith.constant 0 : i32
    %c0_i32_0 = arith.constant 0 : i32
    %c0_i32_1 = arith.constant 0 : i32
    return %c0_i32, %c0_i32_0 : i32, i32
  }
  func.func @transform_2(%arg0: i32) -> (i32, i32) {
    %c0_i32 = arith.constant 0 : i32
    %c0_i32_0 = arith.constant 0 : i32
    %c0_i32_1 = arith.constant 0 : i32
    return %c0_i32, %c0_i32_0 : i32, i32
  }
  func.func @transform_3(%arg0: i32) -> (i32, i32) {
    %c0_i32 = arith.constant 0 : i32
    %c0_i32_0 = arith.constant 0 : i32
    %c0_i32_1 = arith.constant 0 : i32
    return %c0_i32, %c0_i32_0 : i32, i32
  }
  func.func @transform_4(%arg0: i32) -> (i32, i32) {
    %c0_i32 = arith.constant 0 : i32
    %c0_i32_0 = arith.constant 0 : i32
    %c0_i32_1 = arith.constant 0 : i32
    return %c0_i32, %c0_i32_0 : i32, i32
  }
  func.func @transform_5(%arg0: i32) -> (i32, i32, i32) {
    %c0_i32 = arith.constant 0 : i32
    %c0_i32_0 = arith.constant 0 : i32
    %c0_i32_1 = arith.constant 0 : i32
    return %arg0, %c0_i32, %c0_i32_0 : i32, i32, i32
  }
}

</mosaic_0001>

<bundles_post_ra>
// kernel: attention_lg_forward.1
= control target key start
LH: loop header
LB: loop body
LE: loop exit
PB: predicated region body
PF: predicated region fallthrough
CT: control target
= control target key end

     0   :  { %s2277_s18 = smov 0   ;;  %s3326_s0 = inlined_call_operand.vmem [shape: f32[8,8,256], index: 0, kind: input, shape index: {}]   ;;  %s3327_s1 = inlined_call_operand.vmem [shape: f32[8,1024], index: 1, kind: input, shape index: {}]   ;;  %s3328_s2 = inlined_call_operand.vmem [shape: bf16[16,73], index: 2, kind: input, shape index: {}]   ;;  %s3329_s3 = inlined_call_operand.vmem [shape: bf16[8,16], index: 3, kind: input, shape index: {}]   ;;  %s3330_s4 = inlined_call_operand.vmem [shape: f32[8,1], index: 4, kind: input, shape index: {}]   ;;  %s3331_s5 = inlined_call_operand.vmem [shape: f32[8,8,256], index: 5, kind: output, shape index: {}]  }
   0x1 LB: > { %s2142_s19 = sadd.s32 4294967295, %s2230_s18   ;;  %p2146_p0 = scmp.ge.s32.totalorder %s2230_s18, 1  ;;  %s2230_s18 = sphi %s2277_s18, %s15_s18  }
   0x2   : > { %p189_p1 = scmp.lt.s32.totalorder %s2230_s18, 3 }
   0x4   : > { %p190_p2 = pnand %p2146_p0, %p189_p1 }
   0x5   : > { %s2232_s28 = smov (!%p190_p2), 17   ;;  %s2233_s29 = smov (!%p190_p2), 16  }
   0x6   : > { %193 = sbr.rel (%p190_p2) target bundleno = 958 (0x3be), region = 40  ;;  %s2234_s13 = smov (!%p190_p2), 15  }
   0x7   : > { %s2235_s14 = smov (!%p190_p2), 1   ;;  %s2236_s21 = smov (!%p190_p2), 127  }
   0x8   : > { %s2237_s26 = smov (!%p190_p2), 113   ;;  %s2238_s8 = smov (!%p190_p2), 112  }
   0x9   : > { %s2239_s12 = smov (!%p190_p2), 94   ;;  %s2242_s15 = smov (!%p190_p2), 111  }
   0xa   : > { %s2243_s16 = smov (!%p190_p2), 110   ;;  %s2244_s24 = smov (!%p190_p2), 126  }
   0xb   : > { %v269_v0 = vlaneseq  ;;  %v2171_v1 = vld [vmem:[%s3327_s1 + $0x7] ss:$8 sm:$0xf]  ;;  %v2169_v9 = vld [vmem:[%s3327_s1 + $0x6] ss:$8 sm:$0xf] }
   0xc   : > { %v2172_v2 = vld [vmem:[%s3327_s1 + $0x7] ss:$8 sm:$0xf0]  ;;  %v2170_v10 = vld [vmem:[%s3327_s1 + $0x6] ss:$8 sm:$0xf0] }
   0xd   : > { %v2291_v3 = vshrl.u32 %v269_v0, 7  ;;  %v2293_v4 = vor.u32 %v2172_v2, %v2171_v1  ;;  %v2326_v16 = vor.u32 %v2170_v10, %v2169_v9  ;;  %v2167_v21 = vld [vmem:[%s3327_s1 + $0x5] ss:$8 sm:$0xf]  ;;  %vm950_vm0 = vcmask 138240  }
   0xe   : > { %v2168_v22 = vld [vmem:[%s3327_s1 + $0x5] ss:$8 sm:$0xf0]  ;;  %v2165_v28 = vld [vmem:[%s3327_s1 + $0x4] ss:$8 sm:$0xf] }
   0xf   : > { %v2296_v5 = vsub.s32 2, %v2291_v3  ;;  %v2299_v6 = vsub.s32 0, %v2291_v3  ;;  %v2302_v7 = vsub.s32 3, %v2291_v3  ;;  %v2305_v8 = vsub.s32 1, %v2291_v3 }
  0x10   : > { %v2324_v15 = vsub.s32 4, %v2291_v3  ;;  %v2352_v25 = vor.u32 %v2168_v22, %v2167_v21  ;;  %v2166_v29 = vld [vmem:[%s3327_s1 + $0x4] ss:$8 sm:$0xf0]  ;;  %v2413_v46 = vsub.s32 5, %v2291_v3  ;;  %v2466_v9 = vsub.s32 6, %v2291_v3 }
  0x11   : > { %v913_v11 = vrot.slane %v2293_v4, %v2296_v5  ;;  %v905_v12 = vrot.slane %v2293_v4, %v2299_v6  ;;  %v917_v13 = vrot.slane %v2293_v4, %v2302_v7  ;;  %v909_v14 = vrot.slane %v2293_v4, %v2305_v8  ;;  %v2163_v37 = vld [vmem:[%s3327_s1 + $0x3] ss:$8 sm:$0xf]  ;;  %v2161_v47 = vld [vmem:[%s3327_s1 + $0x2] ss:$8 sm:$0xf] }
  0x12   : > { %v921_v17 = vrot.slane %v2293_v4, %v2324_v15  ;;  %v817_v18 = vrot.slane %v2326_v16, %v2299_v6  ;;  %v821_v19 = vrot.slane %v2326_v16, %v2305_v8  ;;  %v825_v20 = vrot.slane %v2326_v16, %v2296_v5  ;;  %v2164_v38 = vld [vmem:[%s3327_s1 + $0x3] ss:$8 sm:$0xf0]  ;;  %v2162_v48 = vld [vmem:[%s3327_s1 + $0x2] ss:$8 sm:$0xf0] }
  0x13   : > { %938 = vrot.lane.b32.xlu1 %v913_v11, %s2232_s28  ;;  %934 = vrot.lane.b32.xlu0 %v905_v12, %s2232_s28  ;;  %v829_v23 = vrot.slane %v2326_v16, %v2302_v7  ;;  %v833_v24 = vrot.slane %v2326_v16, %v2324_v15  ;;  %v733_v26 = vrot.slane %v2352_v25, %v2305_v8  ;;  %v2159_v56 = vld [vmem:[%s3327_s1 + $0x1] ss:$8 sm:$0xf]  ;;  %v2475_v12 = vsub.s32 7, %v2291_v3 }
  0x14   : > { %v729_v27 = vrot.slane %v2352_v25, %v2299_v6  ;;  %v741_v30 = vrot.slane %v2352_v25, %v2302_v7  ;;  %v737_v31 = vrot.slane %v2352_v25, %v2296_v5  ;;  %v2372_v32 = vor.u32 %v2166_v29, %v2165_v28  ;;  %v2160_v57 = vld [vmem:[%s3327_s1 + $0x1] ss:$8 sm:$0xf0] }
  0x15   : > { %v745_v33 = vrot.slane %v2352_v25, %v2324_v15  ;;  %v2398_v41 = vor.u32 %v2164_v38, %v2163_v37  ;;  %v2427_v51 = vor.u32 %v2162_v48, %v2161_v47  ;;  %v355_v60 = vor.u32 %v2160_v57, %v2159_v56 }
  0x16   : > { %v641_v34 = vrot.slane %v2372_v32, %v2299_v6  ;;  %v645_v35 = vrot.slane %v2372_v32, %v2305_v8  ;;  %v649_v36 = vrot.slane %v2372_v32, %v2296_v5  ;;  %v653_v39 = vrot.slane %v2372_v32, %v2302_v7 }
  0x17   : > { %940 = vrot.lane.b32.xlu1 %v917_v13, %s2232_s28  ;;  %936 = vrot.lane.b32.xlu0 %v909_v14, %s2232_s28  ;;  %v657_v40 = vrot.slane %v2372_v32, %v2324_v15  ;;  %v540_v42 = vrot.slane %v2398_v41, %v2305_v8  ;;  %v536_v43 = vrot.slane %v2398_v41, %v2299_v6  ;;  %vm862_vm1 = vcmask 130048  }
  0x18   : > { %v548_v44 = vrot.slane %v2398_v41, %v2302_v7  ;;  %v544_v45 = vrot.slane %v2398_v41, %v2296_v5  ;;  %v556_v49 = vrot.slane %v2398_v41, %v2413_v46  ;;  %v552_v50 = vrot.slane %v2398_v41, %v2324_v15 }
  0x19   : > { %v452_v52 = vrot.slane %v2427_v51, %v2305_v8  ;;  %v448_v53 = vrot.slane %v2427_v51, %v2299_v6  ;;  %v460_v54 = vrot.slane %v2427_v51, %v2302_v7  ;;  %v456_v55 = vrot.slane %v2427_v51, %v2296_v5 }
  0x1a   : > { %v468_v58 = vrot.slane %v2427_v51, %v2413_v46  ;;  %v464_v59 = vrot.slane %v2427_v51, %v2324_v15  ;;  %v364_v61 = vrot.slane %v355_v60, %v2305_v8  ;;  %v360_v62 = vrot.slane %v355_v60, %v2299_v6 }
  0x1b   : > { %942 = vrot.lane.b32.xlu0 %v921_v17, %s2232_s28  ;;  %846 = vrot.lane.b32.xlu1 %v817_v18, %s2233_s29  ;;  %v372_v63 = vrot.slane %v355_v60, %v2302_v7  ;;  %v368_v0 = vrot.slane %v355_v60, %v2296_v5  ;;  %v380_v1 = vrot.slane %v355_v60, %v2413_v46  ;;  %vm774_vm2 = vcmask 121856  }
  0x1c   : > { %v376_v2 = vrot.slane %v355_v60, %v2324_v15  ;;  %v929_v10 = vrot.slane %v2293_v4, %v2466_v9  ;;  %v925_v11 = vrot.slane %v2293_v4, %v2413_v46  ;;  %v837_v13 = vrot.slane %v2326_v16, %v2413_v46 }
  0x1d   : > { %v933_v14 = vrot.slane %v2293_v4, %v2475_v12  ;;  %v845_v17 = vrot.slane %v2326_v16, %v2475_v12  ;;  %v841_v3 = vrot.slane %v2326_v16, %v2466_v9  ;;  %v753_v18 = vrot.slane %v2352_v25, %v2466_v9 }
  0x1e   : > { %v749_v4 = vrot.slane %v2352_v25, %v2413_v46  ;;  %v757_v16 = vrot.slane %v2352_v25, %v2475_v12  ;;  %v669_v21 = vrot.slane %v2372_v32, %v2475_v12  ;;  %v560_v22 = vrot.slane %v2398_v41, %v2466_v9 }
  0x1f   : > { %848 = vrot.lane.b32.xlu0 %v821_v19, %s2233_s29  ;;  %850 = vrot.lane.b32.xlu1 %v825_v20, %s2233_s29  ;;  %v661_v19 = vrot.slane %v2372_v32, %v2413_v46  ;;  %v665_v20 = vrot.slane %v2372_v32, %v2466_v9  ;;  %v476_v25 = vrot.slane %v2427_v51, %v2475_v12  ;;  %vm686_vm3 = vcmask 7168  }
  0x20   : > { %vm493_vm4 = vcmask 924672   ;;  %vm581_vm5 = vcmask 1039360   ;;  %vm405_vm6 = vcmask 916480   ;;  %vm1296_vm7 = vcmask 769024  }
  0x21   : > { %vm1305_vm8 = vcmask 1043456   ;;  %vm1260_vm9 = vcmask 777216   ;;  %vm1215_vm10 = vcmask 785408   ;;  %vm1179_vm11 = vcmask 900096  }
  0x22   : > { %vm317_vm12 = vcmask 908288   ;;  %vm1057_vm13 = vcmask 1031168   ;;  %vm1652_vm14 = vcmask 1044480   ;;  %vm1648_vm15 = vcmask 596992  }
  0x23   : > { %852 = vrot.lane.b32.xlu0 %v829_v23, %s2233_s29  ;;  %854 = vrot.lane.b32.xlu1 %v833_v24, %s2233_s29  ;;  %v564_v23 = vrot.slane %v2398_v41, %v2475_v12  ;;  %v472_v24 = vrot.slane %v2427_v51, %v2466_v9 }
  0x27   : > { %760 = vrot.lane.b32.xlu1 %v733_v26, %s2234_s13  ;;  %758 = vrot.lane.b32.xlu0 %v729_v27, %s2234_s13  ;;  %v384_v26 = vrot.slane %v355_v60, %v2466_v9  ;;  %v388_v27 = vrot.slane %v355_v60, %v2475_v12 }
  0x2b   : > { %764 = vrot.lane.b32.xlu1 %v741_v30, %s2234_s13  ;;  %762 = vrot.lane.b32.xlu0 %v737_v31, %s2234_s13 }
  0x2f   : > { %766 = vrot.lane.b32.xlu0 %v745_v33, %s2234_s13  ;;  %670 = vrot.lane.b32.xlu1 %v641_v34, %s2235_s14 }
  0x33   : > { %672 = vrot.lane.b32.xlu0 %v645_v35, %s2235_s14  ;;  %674 = vrot.lane.b32.xlu1 %v649_v36, %s2235_s14 }
  0x37   : > { %676 = vrot.lane.b32.xlu0 %v653_v39, %s2235_s14  ;;  %678 = vrot.lane.b32.xlu1 %v657_v40, %s2235_s14 }
  0x3b   : > { %567 = vrot.lane.b32.xlu1 %v540_v42, %s2236_s21  ;;  %565 = vrot.lane.b32.xlu0 %v536_v43, %s2236_s21 }
  0x3f   : > { %571 = vrot.lane.b32.xlu1 %v548_v44, %s2236_s21  ;;  %569 = vrot.lane.b32.xlu0 %v544_v45, %s2236_s21 }
  0x43   : > { %575 = vrot.lane.b32.xlu1 %v556_v49, %s2236_s21  ;;  %573 = vrot.lane.b32.xlu0 %v552_v50, %s2236_s21 }
  0x47   : > { %479 = vrot.lane.b32.xlu1 %v452_v52, %s2237_s26  ;;  %477 = vrot.lane.b32.xlu0 %v448_v53, %s2237_s26 }
  0x4b   : > { %483 = vrot.lane.b32.xlu1 %v460_v54, %s2237_s26  ;;  %481 = vrot.lane.b32.xlu0 %v456_v55, %s2237_s26 }
  0x4f   : > { %487 = vrot.lane.b32.xlu1 %v468_v58, %s2237_s26  ;;  %485 = vrot.lane.b32.xlu0 %v464_v59, %s2237_s26 }
  0x53   : > { %391 = vrot.lane.b32.xlu1 %v364_v61, %s2238_s8  ;;  %389 = vrot.lane.b32.xlu0 %v360_v62, %s2238_s8 }
  0x57   : > { %395 = vrot.lane.b32.xlu1 %v372_v63, %s2238_s8  ;;  %393 = vrot.lane.b32.xlu0 %v368_v0, %s2238_s8 }
  0x5b   : > { %399 = vrot.lane.b32.xlu1 %v380_v1, %s2238_s8  ;;  %397 = vrot.lane.b32.xlu0 %v376_v2, %s2238_s8 }
  0x5f   : > { %946 = vrot.lane.b32.xlu1 %v929_v10, %s2232_s28  ;;  %944 = vrot.lane.b32.xlu0 %v925_v11, %s2232_s28 }
  0x63   : > { %856 = vrot.lane.b32.xlu1 %v837_v13, %s2233_s29  ;;  %948 = vrot.lane.b32.xlu0 %v933_v14, %s2232_s28 }
  0x67   : > { %860 = vrot.lane.b32.xlu1 %v845_v17, %s2233_s29  ;;  %858 = vrot.lane.b32.xlu0 %v841_v3, %s2233_s29  ;;  %s2147_s29 = sshll.u32 %s2142_s19, 2 }
  0x68   : > { %p220_p3 = scmp.lt.s32.totalorder %s2147_s29, 7 }
  0x6a   : > { %s3333_s29 = smov (!%p220_p3, %s2147_s29), 7 }
  0x6b   : > { %770 = vrot.lane.b32.xlu1 %v753_v18, %s2234_s13  ;;  %768 = vrot.lane.b32.xlu0 %v749_v4, %s2234_s13  ;;  %s2196_s19 = sshll.u32 %s3333_s29, 4 }
  0x6c   : > { %s2535_s11 = scalar_lea.vmem %s3326_s0, %s2196_s19 }
  0x6d   : > { %v2538_v28 = vld [vmem:[%s2535_s11] sm:$0xff]  ;;  %v2542_v33 = vld [vmem:[%s2535_s11 + $0x10] sm:$0xff]  ;;  %v2562_v52 = vld [vmem:[%s2535_s11 + $0x8] sm:$0xff] }
  0x6e   : > { %v2548_v38 = vld [vmem:[%s2535_s11 + $0x20] sm:$0xff]  ;;  %v2572_v0 = vld [vmem:[%s2535_s11 + $0x18] sm:$0xff] }
  0x6f   : > { %680 = vrot.lane.b32.xlu1 %v661_v19, %s2235_s14  ;;  %772 = vrot.lane.b32.xlu0 %v757_v16, %s2234_s13  ;;  %s2240_s13 = smov 96  }
  0x73   : > { %682 = vrot.lane.b32.xlu0 %v665_v20, %s2235_s14  ;;  %684 = vrot.lane.b32.xlu1 %v669_v21, %s2235_s14  ;;  %s2241_s14 = smov 95  }
  0x77   : > { %577 = vrot.lane.b32.xlu0 %v560_v22, %s2236_s21  ;;  %579 = vrot.lane.b32.xlu1 %v564_v23, %s2236_s21 }
  0x7b   : > { %489 = vrot.lane.b32.xlu0 %v472_v24, %s2237_s26  ;;  %491 = vrot.lane.b32.xlu1 %v476_v25, %s2237_s26 }
  0x7f   : > { %401 = vrot.lane.b32.xlu0 %v384_v26, %s2238_s8  ;;  %403 = vrot.lane.b32.xlu1 %v388_v27, %s2238_s8 }
  0x85   : > { %v939_v29 = vpop.permute.xlu1 %938  ;;  %v935_v30 = vpop.permute.xlu0 %934 }
  0x86   : > { %v967_v31 = vmul.f32 %v935_v30, %v2538_v28 }
  0x88   : > { %v976_v32 = vpack.c.bf16 %v967_v31, %v967_v31 }
  0x89   : > { %v941_v34 = vpop.permute.xlu1 %940  ;;  %v937_v35 = vpop.permute.xlu0 %936 }
  0x8a   : > { %v952_v36 = vsel %vm950_vm0, %v937_v35, %v939_v29  ;;  %1278 = vrot.lane.b32.xlu0 %v976_v32, %s2239_s12  ;;  %v951_v50 = vsel %vm950_vm0, %v935_v30, %v937_v35  ;;  %v953_v61 = vsel %vm950_vm0, %v939_v29, %v941_v34 }
  0x8b   : > { %v969_v37 = vmul.f32 %v2542_v33, %v952_v36  ;;  %v968_v60 = vmul.f32 %v951_v50, %v2562_v52  ;;  %v970_v14 = vmul.f32 %v2572_v0, %v953_v61 }
  0x8d   : > { %v2550_v39 = vpop.permute.xlu0 %942  ;;  %v847_v40 = vpop.permute.xlu1 %846  ;;  %v978_v41 = vpack.c.bf16 %v969_v37, %v969_v37  ;;  %v977_v13 = vpack.c.bf16 %v968_v60, %v968_v60  ;;  %v979_v24 = vpack.c.bf16 %v970_v14, %v970_v14 }
  0x8e   : > { %v954_v42 = vsel %vm950_vm0, %v941_v34, %v2550_v39  ;;  %v879_v51 = vmul.f32 %v847_v40, %v2538_v28 }
  0x8f   : > { %1282 = vrot.lane.b32.xlu0 %v978_v41, %s2239_s12  ;;  %v971_v43 = vmul.f32 %v2548_v38, %v954_v42 }
  0x90   : > { %v888_v62 = vpack.c.bf16 %v879_v51, %v879_v51 }
  0x91   : > { %v849_v44 = vpop.permute.xlu0 %848  ;;  %v851_v45 = vpop.permute.xlu1 %850  ;;  %v980_v47 = vpack.c.bf16 %v971_v43, %v971_v43 }
  0x92   : > { %v864_v55 = vsel %vm862_vm1, %v849_v44, %v851_v45  ;;  %v863_v17 = vsel %vm862_vm1, %v847_v40, %v849_v44  ;;  %v1233_v4 = vrot.slane %v888_v62, 4 }
  0x93   : > { %1286 = vrot.lane.b32.xlu0 %v980_v47, %s2239_s12  ;;  %v881_v63 = vmul.f32 %v2542_v33, %v864_v55  ;;  %v880_v23 = vmul.f32 %v863_v17, %v2562_v52 }
  0x95   : > { %v853_v48 = vpop.permute.xlu0 %852  ;;  %v2557_v49 = vpop.permute.xlu1 %854  ;;  %v890_v19 = vpack.c.bf16 %v881_v63, %v881_v63  ;;  %v889_v32 = vpack.c.bf16 %v880_v23, %v880_v23 }
  0x96   : > { %v866_v16 = vsel %vm862_vm1, %v853_v48, %v2557_v49  ;;  %v865_v34 = vsel %vm862_vm1, %v851_v45, %v853_v48 }
  0x97   : > { %v883_v25 = vmul.f32 %v2548_v38, %v866_v16  ;;  %v1235_v29 = vrot.slane %v890_v19, 4  ;;  %v882_v42 = vmul.f32 %v2572_v0, %v865_v34  ;;  %v1234_v44 = vrot.slane %v889_v32, 4 }
  0x98   : > { %v620_v19 = vpack.c.bf16 %v2548_v38, %v2548_v38 }
  0x99   : > { %v761_v53 = vpop.permute.xlu1 %760  ;;  %v759_v54 = vpop.permute.xlu0 %758  ;;  %v892_v40 = vpack.c.bf16 %v883_v25, %v883_v25 }
  0x9a   : > { %v775_v56 = vsel %vm774_vm2, %v759_v54, %v761_v53  ;;  %v791_v57 = vmul.f32 %v759_v54, %v2538_v28  ;;  %v617_v54 = vpack.c.bf16 %v2562_v52, %v2562_v52 }
  0x9b   : > { %v792_v58 = vmul.f32 %v775_v56, %v2562_v52  ;;  %v1237_v50 = vrot.slane %v892_v40, 4  ;;  %v891_v56 = vpack.c.bf16 %v882_v42, %v882_v42 }
  0x9c   : > { %v800_v59 = vpack.c.bf16 %v791_v57, %v791_v57 }
  0x9d   : > { %v765_v1 = vpop.permute.xlu1 %764  ;;  %v763_v2 = vpop.permute.xlu0 %762  ;;  %v801_v10 = vpack.c.bf16 %v792_v58, %v792_v58  ;;  %v1236_v62 = vrot.slane %v891_v56, 4 }
  0x9e   : > { %1197 = vrot.lane.b32.xlu1 %v800_v59, %s2240_s13  ;;  %v776_v11 = vsel %vm774_vm2, %v761_v53, %v763_v2  ;;  %v777_v35 = vsel %vm774_vm2, %v763_v2, %v765_v1 }
  0x9f   : > { %1199 = vrot.lane.b32.xlu0 %v801_v10, %s2240_s13  ;;  %v793_v21 = vmul.f32 %v2542_v33, %v776_v11  ;;  %v794_v45 = vmul.f32 %v2572_v0, %v777_v35  ;;  %v616_v10 = vpack.c.bf16 %v2538_v28, %v2538_v28 }
  0xa1   : > { %v2579_v3 = vpop.permute.xlu0 %766  ;;  %v671_v18 = vpop.permute.xlu1 %670  ;;  %v802_v30 = vpack.c.bf16 %v793_v21, %v793_v21  ;;  %v803_v55 = vpack.c.bf16 %v794_v45, %v794_v45  ;;  %v265_v21 = vld [vmem:[%s3327_s1] ss:$8 sm:$0xf] }
  0xa2   : > { %v778_v20 = vsel %vm774_vm2, %v765_v1, %v2579_v3  ;;  %1280 = vrot.lane.b32.xlu1 %v977_v13, %s2239_s12  ;;  %v703_v41 = vmul.f32 %v671_v18, %v2538_v28 }
  0xa3   : > { %1242 = vrot.lane.b32.xlu0 %v1233_v4, %s2241_s14  ;;  %v795_v22 = vmul.f32 %v2548_v38, %v778_v20 }
  0xa4   : > { %v712_v51 = vpack.c.bf16 %v703_v41, %v703_v41 }
  0xa5   : > { %v673_v26 = vpop.permute.xlu0 %672  ;;  %v675_v27 = vpop.permute.xlu1 %674  ;;  %v804_v31 = vpack.c.bf16 %v795_v22, %v795_v22  ;;  %v266_v22 = vld [vmem:[%s3327_s1] ss:$8 sm:$0xf0] }
  0xa6   : > { %1284 = vrot.lane.b32.xlu1 %v979_v24, %s2239_s12  ;;  %v688_v43 = vsel %vm686_vm3, %v673_v26, %v675_v27  ;;  %v1152_v59 = vrot.slane %v712_v51, 4  ;;  %v687_v63 = vsel %vm686_vm3, %v671_v18, %v673_v26  ;;  %v618_v18 = vpack.c.bf16 %v2542_v33, %v2542_v33 }
  0xa7   : > { %1246 = vrot.lane.b32.xlu0 %v1235_v29, %s2241_s14  ;;  %v705_v53 = vmul.f32 %v2542_v33, %v688_v43  ;;  %v704_v14 = vmul.f32 %v687_v63, %v2562_v52  ;;  %v2650_v29 = vor.u32 %v266_v22, %v265_v21 }
  0xa9   : > { %v677_v36 = vpop.permute.xlu0 %676  ;;  %v2595_v37 = vpop.permute.xlu1 %678  ;;  %v714_v60 = vpack.c.bf16 %v705_v53, %v705_v53  ;;  %v713_v20 = vpack.c.bf16 %v704_v14, %v704_v14  ;;  %v276_v35 = vrot.slane %v2650_v29, %v2305_v8  ;;  %v280_v63 = vrot.slane %v2650_v29, %v2296_v5 }
  0xaa   : > { %1201 = vrot.lane.b32.xlu1 %v802_v30, %s2240_s13  ;;  %v690_v61 = vsel %vm686_vm3, %v677_v36, %v2595_v37  ;;  %v689_v23 = vsel %vm686_vm3, %v675_v27, %v677_v36  ;;  %v619_v27 = vpack.c.bf16 %v2572_v0, %v2572_v0  ;;  %v284_v5 = vrot.slane %v2650_v29, %v2302_v7 }
  0xab   : > { %1205 = vrot.lane.b32.xlu0 %v804_v31, %s2240_s13  ;;  %v707_v11 = vmul.f32 %v2548_v38, %v690_v61  ;;  %v1154_v13 = vrot.slane %v714_v60, 4  ;;  %v706_v30 = vmul.f32 %v2572_v0, %v689_v23  ;;  %v1153_v32 = vrot.slane %v713_v20, 4 }
  0xad   : > { %v2603_v47 = vpop.permute.xlu1 %567  ;;  %v2605_v48 = vpop.permute.xlu0 %565  ;;  %v716_v16 = vpack.c.bf16 %v707_v11, %v707_v11  ;;  %v715_v42 = vpack.c.bf16 %v706_v30, %v706_v30 }
  0xae   : > { %1244 = vrot.lane.b32.xlu1 %v1234_v44, %s2241_s14  ;;  %v582_v60 = vsel %vm581_vm5, %v2605_v48, %v2603_v47 }
  0xaf   : > { %1250 = vrot.lane.b32.xlu0 %v1237_v50, %s2241_s14  ;;  %v1156_v26 = vrot.slane %v716_v16, 4  ;;  %v1155_v50 = vrot.slane %v715_v42, 4 }
  0xb1   : > { %v2612_v57 = vpop.permute.xlu1 %571  ;;  %v2614_v58 = vpop.permute.xlu0 %569 }
  0xb2   : > { %1203 = vrot.lane.b32.xlu1 %v803_v55, %s2240_s13  ;;  %v583_v44 = vsel %vm581_vm5, %v2603_v47, %v2614_v58  ;;  %v272_v55 = vrot.slane %v2650_v29, %v2299_v6 }
  0xb3   : > { %1121 = vrot.lane.b32.xlu0 %v617_v54, %s2242_s15  ;;  %v600_v51 = vmul.f32 %v583_v44, %v2562_v52  ;;  %v288_v44 = vrot.slane %v2650_v29, %v2324_v15 }
  0xb5   : > { %v2621_v1 = vpop.permute.xlu1 %575  ;;  %v2623_v2 = vpop.permute.xlu0 %573 }
  0xb6   : > { %1248 = vrot.lane.b32.xlu1 %v1236_v62, %s2241_s14  ;;  %v609_v62 = vpack.c.bf16 %v600_v51, %v600_v51  ;;  %v585_v21 = vsel %vm581_vm5, %v2612_v57, %v2623_v2  ;;  %v598_v51 = vmul.f32 0.0, %v2605_v48 }
  0xb7   : > { %1161 = vrot.lane.b32.xlu0 %v1152_v59, %s2243_s16 }
  0xb8   : > { %v1077_v14 = vrot.slane %v609_v62, 4  ;;  %v607_v48 = vpack.c.bf16 %v598_v51, %v598_v51 }
  0xb9   : > { %v480_v17 = vpop.permute.xlu1 %479  ;;  %v2631_v4 = vpop.permute.xlu0 %477 }
  0xba   : > { %1119 = vrot.lane.b32.xlu1 %v616_v10, %s2242_s15  ;;  %v494_v31 = vsel %vm493_vm4, %v2631_v4, %v480_v17  ;;  %v599_v10 = vmul.f32 %v582_v60, %v2538_v28 }
  0xbb   : > { %1165 = vrot.lane.b32.xlu0 %v1154_v13, %s2243_s16  ;;  %v511_v36 = vmul.f32 %v494_v31, %v2538_v28  ;;  %v584_v13 = vsel %vm581_vm5, %v2614_v58, %v2612_v57  ;;  %v510_v58 = vmul.f32 0.0, %v2631_v4 }
  0xbc   : > { %v608_v16 = vpack.c.bf16 %v599_v10, %v599_v10 }
  0xbd   : > { %v482_v24 = vpop.permute.xlu0 %481  ;;  %v2646_v25 = vpop.permute.xlu1 %483  ;;  %v520_v8 = vpack.c.bf16 %v511_v36, %v511_v36  ;;  %v519_v31 = vpack.c.bf16 %v510_v58, %v510_v58 }
  0xbe   : > { %1123 = vrot.lane.b32.xlu1 %v618_v18, %s2242_s15  ;;  %v496_v40 = vsel %vm493_vm4, %v482_v24, %v2646_v25  ;;  %v495_v56 = vsel %vm493_vm4, %v480_v17, %v482_v24  ;;  %v601_v18 = vmul.f32 %v2542_v33, %v584_v13  ;;  %v1076_v4 = vrot.slane %v608_v16, 4 }
  0xbf   : > { %1127 = vrot.lane.b32.xlu0 %v620_v19, %s2242_s15  ;;  %v513_v45 = vmul.f32 %v2542_v33, %v496_v40  ;;  %v512_v6 = vmul.f32 %v495_v56, %v2562_v52 }
  0xc0   : > { %v610_v24 = vpack.c.bf16 %v601_v18, %v601_v18 }
  0xc1   : > { %v2655_v34 = vpop.permute.xlu0 %485  ;;  %v2666_v41 = vpop.permute.xlu1 %487  ;;  %v522_v59 = vpack.c.bf16 %v513_v45, %v513_v45  ;;  %v521_v17 = vpack.c.bf16 %v512_v6, %v512_v6 }
  0xc2   : > { %1163 = vrot.lane.b32.xlu1 %v1153_v32, %s2243_s16  ;;  %v498_v19 = vsel %vm493_vm4, %v2655_v34, %v2666_v41  ;;  %v1078_v36 = vrot.slane %v610_v24, 4  ;;  %v497_v40 = vsel %vm493_vm4, %v2646_v25, %v2655_v34  ;;  %v586_v25 = vsel %vm581_vm5, %v2623_v2, %v2621_v1  ;;  %v2783_v24 = vld [vmem:[%s2535_s11 + $0x38] sm:$0xff] }
  0xc3   : > { %1169 = vrot.lane.b32.xlu0 %v1156_v26, %s2243_s16  ;;  %v515_v7 = vmul.f32 %v2548_v38, %v498_v19  ;;  %v602_v26 = vmul.f32 %v2572_v0, %v585_v21  ;;  %v603_v62 = vmul.f32 %v2548_v38, %v586_v25  ;;  %v2768_v19 = vld [vmem:[%s2535_s11 + $0x28] sm:$0xff] }
  0xc5   : > { %v2668_v43 = vpop.permute.xlu0 %389  ;;  %v2679_v54 = vpop.permute.xlu1 %391  ;;  %v524_v32 = vpack.c.bf16 %v515_v7, %v515_v7  ;;  %v611_v42 = vpack.c.bf16 %v602_v26, %v602_v26 }
  0xc6   : > { %1125 = vrot.lane.b32.xlu1 %v619_v27, %s2242_s15  ;;  %v406_v23 = vsel %vm405_vm6, %v2668_v43, %v2679_v54  ;;  %v422_v16 = vmul.f32 0.0, %v2668_v43 }
  0xc7   : > { %303 = vrot.lane.b32.xlu0 %v276_v35, %s2242_s15  ;;  %v423_v57 = vmul.f32 %v406_v23, %v2538_v28  ;;  %v1079_v34 = vrot.slane %v611_v42, 4 }
  0xc8   : > { %v431_v43 = vpack.c.bf16 %v422_v16, %v422_v16 }
  0xc9   : > { %v2677_v53 = vpop.permute.xlu0 %393  ;;  %v396_v11 = vpop.permute.xlu1 %395 }
  0xca   : > { %1167 = vrot.lane.b32.xlu1 %v1155_v50, %s2243_s16  ;;  %v408_v27 = vsel %vm405_vm6, %v2677_v53, %v396_v11  ;;  %v407_v2 = vsel %vm405_vm6, %v2679_v54, %v2677_v53  ;;  %v994_v42 = vrot.slane %v431_v43, 4 }
  0xcb   : > { %1041 = vrot.lane.b32.xlu0 %v520_v8, %s2244_s24  ;;  %v432_v8 = vpack.c.bf16 %v423_v57, %v423_v57  ;;  %v425_v45 = vmul.f32 %v2542_v33, %v408_v27  ;;  %v424_v13 = vmul.f32 %v407_v2, %v2562_v52 }
  0xcd   : > { %v2689_v61 = vpop.permute.xlu0 %397  ;;  %v2716_v22 = vpop.permute.xlu1 %399  ;;  %v434_v60 = vpack.c.bf16 %v425_v45, %v425_v45  ;;  %v433_v58 = vpack.c.bf16 %v424_v13, %v424_v13 }
  0xce   : > { %301 = vrot.lane.b32.xlu1 %v272_v55, %s2242_s15  ;;  %v514_v55 = vmul.f32 %v2572_v0, %v497_v40  ;;  %v409_v56 = vsel %vm405_vm6, %v396_v11, %v2689_v61  ;;  %v410_v7 = vsel %vm405_vm6, %v2689_v61, %v2716_v22 }
  0xcf   : > { %1045 = vrot.lane.b32.xlu0 %v522_v59, %s2244_s24  ;;  %v995_v59 = vrot.slane %v432_v8, 4  ;;  %v426_v6 = vmul.f32 %v2572_v0, %v409_v56  ;;  %v997_v11 = vrot.slane %v434_v60, 4  ;;  %v427_v57 = vmul.f32 %v2548_v38, %v410_v7  ;;  %v2803_v8 = vld [vmem:[%s2535_s11 + $0x30] sm:$0xff] }
  0xd1   : > { %v2700_v47 = vpop.permute.xlu0 %944  ;;  %v2732_v35 = vpop.permute.xlu1 %946  ;;  %v435_v18 = vpack.c.bf16 %v426_v6, %v426_v6 }
  0xd2   : > { %305 = vrot.lane.b32.xlu1 %v280_v63, %s2242_s15  ;;  %v523_v63 = vpack.c.bf16 %v514_v55, %v514_v55  ;;  %v955_v53 = vsel %vm950_vm0, %v2550_v39, %v2700_v47  ;;  %v956_v45 = vsel %vm950_vm0, %v2700_v47, %v2732_v35 }
  0xd3   : > { %1088 = vrot.lane.b32.xlu0 %v1077_v14, %s2238_s8  ;;  %v998_v23 = vrot.slane %v435_v18, 4 }
  0xd5   : > { %v2711_v20 = vpop.permute.xlu0 %948  ;;  %v2751_v15 = vpop.permute.xlu1 %856 }
  0xd6   : > { %1043 = vrot.lane.b32.xlu1 %v521_v17, %s2244_s24  ;;  %v1075_v17 = vrot.slane %v607_v48, 4  ;;  %v957_v39 = vsel %vm950_vm0, %v2732_v35, %v2711_v20 }
  0xd7   : > { %307 = vrot.lane.b32.xlu0 %v284_v5, %s2242_s15  ;;  %v612_v5 = vpack.c.bf16 %v603_v62, %v603_v62  ;;  %v975_v62 = vmul.f32 0.0, %v2711_v20 }
  0xd9   : > { %v2725_v30 = vpop.permute.xlu0 %858  ;;  %v2765_v14 = vpop.permute.xlu1 %860  ;;  %v1080_v21 = vrot.slane %v612_v5, 4  ;;  %v984_v20 = vpack.c.bf16 %v975_v62, %v975_v62  ;;  %v296_v62 = vrot.slane %v2650_v29, %v2466_v9 }
  0xda   : > { %1086 = vrot.lane.b32.xlu1 %v1076_v4, %s2238_s8  ;;  %v972_v4 = vmul.f32 %v2768_v19, %v955_v53  ;;  %v869_v47 = vsel %vm862_vm1, %v2725_v30, %v2765_v14 }
  0xdb   : > { %1039 = vrot.lane.b32.xlu0 %v519_v31, %s2244_s24  ;;  %v996_v31 = vrot.slane %v433_v58, 4  ;;  %v886_v6 = vmul.f32 %v2783_v24, %v869_v47 }
  0xdc   : > { %v981_v61 = vpack.c.bf16 %v972_v4, %v972_v4 }
  0xdd   : > { %v2741_v50 = vpop.permute.xlu0 %768  ;;  %v771_v26 = vpop.permute.xlu1 %770 }
  0xde   : > { %1090 = vrot.lane.b32.xlu1 %v1078_v36, %s2238_s8  ;;  %v867_v36 = vsel %vm862_vm1, %v2557_v49, %v2751_v15  ;;  %v779_v40 = vsel %vm774_vm2, %v2579_v3, %v2741_v50 }
  0xdf   : > { %1049 = vrot.lane.b32.xlu0 %v524_v32, %s2244_s24  ;;  %v974_v32 = vmul.f32 %v2783_v24, %v957_v39  ;;  %v884_v51 = vmul.f32 %v2768_v19, %v867_v36  ;;  %v796_v55 = vmul.f32 %v2768_v19, %v779_v40 }
  0xe1   : > { %v2760_v10 = vpop.permute.xlu0 %772  ;;  %v681_v38 = vpop.permute.xlu1 %680  ;;  %v983_v49 = vpack.c.bf16 %v974_v32, %v974_v32  ;;  %v805_v60 = vpack.c.bf16 %v796_v55, %v796_v55 }
  0xe2   : > { %309 = vrot.lane.b32.xlu1 %v288_v44, %s2242_s15  ;;  %v436_v44 = vpack.c.bf16 %v427_v57, %v427_v57  ;;  %v781_v35 = vsel %vm774_vm2, %v771_v26, %v2760_v10 }
  0xe3   : > { %1092 = vrot.lane.b32.xlu0 %v1079_v34, %s2238_s8  ;;  %v973_v34 = vmul.f32 %v2803_v8, %v956_v45  ;;  %v798_v13 = vmul.f32 %v2783_v24, %v781_v35 }
  0xe4   : > { %v999_v25 = vrot.slane %v436_v44, 4 }
  0xe5   : > { %v2774_v54 = vpop.permute.xlu0 %682  ;;  %v685_v56 = vpop.permute.xlu1 %684  ;;  %v982_v48 = vpack.c.bf16 %v973_v34, %v973_v34  ;;  %v807_v53 = vpack.c.bf16 %v798_v13, %v798_v13  ;;  %v622_v34 = vpack.c.bf16 %v2803_v8, %v2803_v8 }
  0xe6   : > { %1047 = vrot.lane.b32.xlu1 %v523_v63, %s2244_s24  ;;  %v868_v63 = vsel %vm862_vm1, %v2751_v15, %v2725_v30  ;;  %v895_v15 = vpack.c.bf16 %v886_v6, %v886_v6  ;;  %v711_v44 = vmul.f32 0.0, %v685_v56  ;;  %v693_v55 = vsel %vm686_vm3, %v2774_v54, %v685_v56 }
  0xe7   : > { %1005 = vrot.lane.b32.xlu0 %v995_v59, %s2236_s21  ;;  %v893_v59 = vpack.c.bf16 %v884_v51, %v884_v51  ;;  %v885_v18 = vmul.f32 %v2803_v8, %v868_v63 }
  0xe9   : > { %v2792_v27 = vpop.permute.xlu0 %577  ;;  %v1238_v2 = vrot.slane %v893_v59, 4  ;;  %v2833_v5 = vpop.permute.xlu1 %579  ;;  %v894_v58 = vpack.c.bf16 %v885_v18, %v885_v18 }
  0xea   : > { %1084 = vrot.lane.b32.xlu1 %v1075_v17, %s2238_s8  ;;  %v587_v9 = vsel %vm581_vm5, %v2621_v1, %v2792_v27 }
  0xeb   : > { %1009 = vrot.lane.b32.xlu0 %v997_v11, %s2236_s21  ;;  %v780_v11 = vsel %vm774_vm2, %v2741_v50, %v771_v26  ;;  %v691_v50 = vsel %vm686_vm3, %v2595_v37, %v681_v38  ;;  %v621_v37 = vpack.c.bf16 %v2768_v19, %v2768_v19  ;;  %v887_v26 = vmul.f32 0.0, %v2765_v14 }
  0xec   : > { %v797_v30 = vmul.f32 %v2803_v8, %v780_v11  ;;  %v708_v4 = vmul.f32 %v2768_v19, %v691_v50  ;;  %v1239_v43 = vrot.slane %v894_v58, 4  ;;  %v604_v1 = vmul.f32 %v2768_v19, %v587_v9 }
  0xed   : > { %v2811_v3 = vpop.permute.xlu0 %489  ;;  %v2844_v7 = vpop.permute.xlu1 %491  ;;  %v896_v32 = vpack.c.bf16 %v887_v26, %v887_v26 }
  0xee   : > { %1094 = vrot.lane.b32.xlu1 %v1080_v21, %s2238_s8  ;;  %v806_v21 = vpack.c.bf16 %v797_v30, %v797_v30  ;;  %v717_v57 = vpack.c.bf16 %v708_v4, %v708_v4  ;;  %v500_v56 = vsel %vm493_vm4, %v2811_v3, %v2844_v7 }
  0xef   : > { %1011 = vrot.lane.b32.xlu0 %v998_v23, %s2236_s21  ;;  %v1240_v23 = vrot.slane %v895_v15, 4  ;;  %v1241_v14 = vrot.slane %v896_v32, 4  ;;  %v517_v13 = vmul.f32 %v2803_v8, %v500_v56  ;;  %v499_v15 = vsel %vm493_vm4, %v2666_v41, %v2811_v3 }
  0xf0   : > { %v1157_v40 = vrot.slane %v717_v57, 4 }
  0xf1   : > { %v2830_v17 = vpop.permute.xlu0 %401  ;;  %v526_v50 = vpack.c.bf16 %v517_v13, %v517_v13 }
  0xf2   : > { %1007 = vrot.lane.b32.xlu1 %v996_v31, %s2236_s21  ;;  %v799_v31 = vmul.f32 0.0, %v2760_v10  ;;  %v623_v10 = vpack.c.bf16 %v2783_v24, %v2783_v24 }
  0xf3   : > { %1288 = vrot.lane.b32.xlu0 %v981_v61, %s2239_s12  ;;  %v2856_v61 = vpop.permute.xlu1 %403 }
  0xf4   : > { %v808_v36 = vpack.c.bf16 %v799_v31, %v799_v31  ;;  %v430_v32 = vmul.f32 %v2783_v24, %v2856_v61 }
  0xf6   : > { %1003 = vrot.lane.b32.xlu1 %v994_v42, %s2236_s21  ;;  %v692_v42 = vsel %vm686_vm3, %v681_v38, %v2774_v54  ;;  %v588_v54 = vsel %vm581_vm5, %v2792_v27, %v2833_v5  ;;  %v516_v27 = vmul.f32 %v2768_v19, %v499_v15 }
  0xf7   : > { %1292 = vrot.lane.b32.xlu0 %v983_v49, %s2239_s12  ;;  %v709_v51 = vmul.f32 %v2803_v8, %v692_v42  ;;  %v605_v11 = vmul.f32 %v2803_v8, %v588_v54 }
  0xf8   : > { %v525_v26 = vpack.c.bf16 %v516_v27, %v516_v27 }
  0xf9   : > { %v718_v59 = vpack.c.bf16 %v709_v51, %v709_v51 }
  0xfa   : > { %1013 = vrot.lane.b32.xlu1 %v999_v25, %s2236_s21  ;;  %v720_v25 = vpack.c.bf16 %v711_v44, %v711_v44 }
  0xfb   : > { %1207 = vrot.lane.b32.xlu0 %v805_v60, %s2240_s13  ;;  %v710_v60 = vmul.f32 %v2783_v24, %v693_v55  ;;  %v1158_v63 = vrot.slane %v718_v59, 4  ;;  %v300_v55 = vrot.slane %v2650_v29, %v2475_v12 }
  0xfc   : > { %v2838_v16 = vpop.permute.xlu0 %1278  ;;  %v1160_v35 = vrot.slane %v720_v25, 4 }
  0xfe   : > { %1290 = vrot.lane.b32.xlu1 %v982_v48, %s2239_s12 }
  0xff   : > { %1252 = vrot.lane.b32.xlu0 %v1238_v2, %s2241_s14  ;;  %v719_v2 = vpack.c.bf16 %v710_v60, %v710_v60 }
 0x101   : > { %v2848_v39 = vpop.permute.xlu0 %1282  ;;  %v1159_v18 = vrot.slane %v719_v2, 4 }
 0x102   : > { %1294 = vrot.lane.b32.xlu1 %v984_v20, %s2239_s12 }
 0x103   : > { %1211 = vrot.lane.b32.xlu0 %v807_v53, %s2240_s13  ;;  %v614_v53 = vpack.c.bf16 %v605_v11, %v605_v11 }
 0x105   : > { %v2861_v45 = vpop.permute.xlu0 %1286  ;;  %v1082_v4 = vrot.slane %v614_v53, 4 }
 0x106   : > { %1209 = vrot.lane.b32.xlu1 %v806_v21, %s2240_s13  ;;  %v411_v21 = vsel %vm405_vm6, %v2716_v22, %v2830_v17 }
 0x107   : > { %1256 = vrot.lane.b32.xlu0 %v1240_v23, %s2241_s14  ;;  %v292_v23 = vrot.slane %v2650_v29, %v2413_v46  ;;  %v428_v3 = vmul.f32 %v2768_v19, %v411_v21  ;;  %v613_v46 = vpack.c.bf16 %v604_v1, %v604_v1 }
 0x109   : > { %v437_v31 = vpack.c.bf16 %v428_v3, %v428_v3 }
 0x10a   : > { %1254 = vrot.lane.b32.xlu1 %v1239_v43, %s2241_s14 }
 0x10b   : > { %1129 = vrot.lane.b32.xlu0 %v621_v37, %s2242_s15  ;;  %v518_v37 = vmul.f32 %v2783_v24, %v2844_v7  ;;  %v1081_v7 = vrot.slane %v613_v46, 4  ;;  %v1000_v44 = vrot.slane %v437_v31, 4 }
 0x10d   : > { %v527_v57 = vpack.c.bf16 %v518_v37, %v518_v37 }
 0x10e   : > { %1213 = vrot.lane.b32.xlu1 %v808_v36, %s2240_s13 }
 0x10f   : > { %1171 = vrot.lane.b32.xlu0 %v1157_v40, %s2243_s16  ;;  %v606_v40 = vmul.f32 %v2783_v24, %v2833_v5 }
 0x110   : > { %v2868_v49 = vpop.permute.xlu1 %1197 }
 0x111   : > { %v2872_v38 = vpop.permute.xlu0 %1199  ;;  %v615_v25 = vpack.c.bf16 %v606_v40, %v606_v40 }
 0x112   : > { %1258 = vrot.lane.b32.xlu1 %v1241_v14, %s2241_s14  ;;  %v439_v14 = vpack.c.bf16 %v430_v32, %v430_v32  ;;  %v1216_v9 = vsel %vm1215_vm10, %v2868_v49, %v2872_v38 }
 0x113   : > { %1133 = vrot.lane.b32.xlu0 %v623_v10, %s2242_s15  ;;  %v412_v10 = vsel %vm405_vm6, %v2830_v17, %v2856_v61  ;;  %v1083_v61 = vrot.slane %v615_v25, 4 }
 0x114   : > { %v2879_v47 = vpop.permute.xlu1 %1280  ;;  %v429_v5 = vmul.f32 %v2803_v8, %v412_v10  ;;  %v1002_v59 = vrot.slane %v439_v14, 4 }
 0x115   : > { %v2881_v48 = vpop.permute.xlu0 %1242  ;;  %v1298_v17 = vsel %vm1296_vm7, %v2879_v47, %v2848_v39  ;;  %v1297_v11 = vsel %vm1296_vm7, %v2838_v16, %v2879_v47 }
 0x116   : > { %1131 = vrot.lane.b32.xlu1 %v622_v34, %s2242_s15  ;;  %v438_v12 = vpack.c.bf16 %v429_v5, %v429_v5  ;;  %v1420_v54 = vsel %vm1305_vm8, %v1298_v17, 1065369472  ;;  %v1418_v53 = vsel %vm1305_vm8, %v1297_v11, 1065369472  ;;  %v1389_v27 = vsel %vm1305_vm8, %v2868_v49, %v2881_v48 }
 0x117   : > { %1177 = vrot.lane.b32.xlu0 %v1160_v35, %s2243_s16 }
 0x118   : > { %v2893_v6 = vpop.permute.xlu1 %1284 }
 0x119   : > { %v2897_v20 = vpop.permute.xlu0 %1246  ;;  %v1299_v56 = vsel %vm1296_vm7, %v2848_v39, %v2893_v6  ;;  %v1300_v1 = vsel %vm1296_vm7, %v2893_v6, %v2861_v45 }
 0x11a   : > { %1173 = vrot.lane.b32.xlu1 %v1158_v63, %s2243_s16  ;;  %v1422_v13 = vsel %vm1305_vm8, %v1299_v56, 1065369472  ;;  %v1424_v37 = vsel %vm1305_vm8, %v1300_v1, 1065369472 }
 0x11b   : > { %313 = vrot.lane.b32.xlu0 %v296_v62, %s2242_s15  ;;  %v1001_v62 = vrot.slane %v438_v12, 4 }
 0x11c   : > { %v2901_v30 = vpop.permute.xlu1 %1201 }
 0x11d   : > { %v2909_v58 = vpop.permute.xlu0 %1205 }
 0x11e   : > { %1175 = vrot.lane.b32.xlu1 %v1159_v18, %s2243_s16 }
 0x11f   : > { %1053 = vrot.lane.b32.xlu0 %v526_v50, %s2244_s24 }
 0x120   : > { %v2920_v41 = vpop.permute.xlu1 %1244 }
 0x121   : > { %v2925_v22 = vpop.permute.xlu0 %1250  ;;  %v1261_v39 = vsel %vm1260_vm9, %v2881_v48, %v2920_v41  ;;  %v1262_v49 = vsel %vm1260_vm9, %v2920_v41, %v2897_v20 }
 0x122   : > { %311 = vrot.lane.b32.xlu1 %v292_v23, %s2242_s15  ;;  %v1392_v47 = vsel %vm1305_vm8, %v1216_v9, %v1261_v39  ;;  %v1416_v23 = vsel %vm1305_vm8, %v2838_v16, 1065369472 }
 0x123   : > { %1098 = vrot.lane.b32.xlu0 %v1082_v4, %s2238_s8 }
 0x124   : > { %v2929_v43 = vpop.permute.xlu1 %1203 }
 0x125   : > { %v2933_v36 = vpop.permute.xlu0 %1121  ;;  %v1219_v16 = vsel %vm1215_vm10, %v2929_v43, %v2909_v58 }
 0x126   : > { %1051 = vrot.lane.b32.xlu1 %v525_v26, %s2244_s24  ;;  %v1217_v26 = vsel %vm1215_vm10, %v2872_v38, %v2901_v30  ;;  %v1218_v38 = vsel %vm1215_vm10, %v2901_v30, %v2929_v43 }
 0x127   : > { %1055 = vrot.lane.b32.xlu0 %v527_v57, %s2244_s24  ;;  %v1395_v41 = vsel %vm1305_vm8, %v1217_v26, %v1262_v49 }
 0x128   : > { %v2939_v42 = vpop.permute.xlu1 %1248 }
 0x129   : > { %v2944_v51 = vpop.permute.xlu0 %1161  ;;  %v1264_v3 = vsel %vm1260_vm9, %v2939_v42, %v2925_v22 }
 0x12a   : > { %1096 = vrot.lane.b32.xlu1 %v1081_v7, %s2238_s8  ;;  %v1401_v48 = vsel %vm1305_vm8, %v1219_v16, %v1264_v3  ;;  %v1263_v7 = vsel %vm1260_vm9, %v2897_v20, %v2939_v42 }
 0x12b   : > { %1015 = vrot.lane.b32.xlu0 %v1000_v44, %s2236_s21  ;;  %v1398_v25 = vsel %vm1305_vm8, %v1218_v38, %v1263_v7 }
 0x12c   : > { %v2951_v34 = vpop.permute.xlu1 %1119 }
 0x12d   : > { %v1166_v60 = vpop.permute.xlu0 %1165  ;;  %v1136_v30 = vsel %vm317_vm12, %v2951_v34, %v2933_v36 }
 0x12e   : > { %315 = vrot.lane.b32.xlu1 %v300_v55, %s2242_s15 }
 0x12f   : > { %1019 = vrot.lane.b32.xlu0 %v1002_v59, %s2236_s21 }
 0x130   : > { %v1124_v29 = vpop.permute.xlu1 %1123 }
 0x131   : > { %v2958_v35 = vpop.permute.xlu0 %1127  ;;  %v1137_v57 = vsel %vm317_vm12, %v2933_v36, %v1124_v29  ;;  %v1362_v36 = vsel %vm1305_vm8, %v2951_v34, %v2944_v51 }
 0x132   : > { %1100 = vrot.lane.b32.xlu1 %v1083_v61, %s2238_s8  ;;  %s3307_s8 = scalar_lea.vmem %s3331_s5, %s2196_s19 }
 0x133   : > { %1561 = vrot.lane.b32.xlu0 %v1420_v54, %s2232_s28 }
 0x134   : > { %v1164_v63 = vpop.permute.xlu1 %1163 }
 0x135   : > { %v2966_v2 = vpop.permute.xlu0 %1169  ;;  %v1181_v46 = vsel %vm1179_vm11, %v1164_v63, %v1166_v60  ;;  %v1180_v20 = vsel %vm1179_vm11, %v2944_v51, %v1164_v63 }
 0x136   : > { %1017 = vrot.lane.b32.xlu1 %v1001_v62, %s2236_s21  ;;  %v1368_v40 = vsel %vm1305_vm8, %v1137_v57, %v1181_v46  ;;  %v1365_v17 = vsel %vm1305_vm8, %v1136_v30, %v1180_v20 }
 0x137   : > { %1563 = vrot.lane.b32.xlu0 %v1422_v13, %s2232_s28 }
 0x138   : > { %v1126_v18 = vpop.permute.xlu1 %1125 }
 0x139   : > { %v2980_v15 = vpop.permute.xlu0 %303  ;;  %v1138_v14 = vsel %vm317_vm12, %v1124_v29, %v1126_v18  ;;  %v1139_v56 = vsel %vm317_vm12, %v1126_v18, %v2958_v35 }
 0x13a   : > { %1559 = vrot.lane.b32.xlu1 %v1418_v53, %s2232_s28 }
 0x13b   : > { %1541 = vrot.lane.b32.xlu0 %v1392_v47, %s2232_s28 }
 0x13c   : > { %v1168_v50 = vpop.permute.xlu1 %1167 }
 0x13d   : > { %v2986_v21 = vpop.permute.xlu0 %1041  ;;  %v1182_v44 = vsel %vm1179_vm11, %v1166_v60, %v1168_v50  ;;  %v1183_v54 = vsel %vm1179_vm11, %v1168_v50, %v2966_v2 }
 0x13e   : > { %1557 = vrot.lane.b32.xlu1 %v1416_v23, %s2232_s28  ;;  %v1371_v42 = vsel %vm1305_vm8, %v1138_v14, %v1182_v44  ;;  %v1374_v11 = vsel %vm1305_vm8, %v1139_v56, %v1183_v54 }
 0x13f   : > { %1539 = vrot.lane.b32.xlu0 %v1389_v27, %s2232_s28 }
 0x140   : > { %v3001_v4 = vpop.permute.xlu1 %301 }
 0x141   : > { %v1046_v6 = vpop.permute.xlu0 %1045  ;;  %v318_v18 = vsel %vm317_vm12, %v3001_v4, %v2980_v15 }
 0x142   : > { %1565 = vrot.lane.b32.xlu1 %v1424_v37, %s2232_s28  ;;  %v335_v37 = vmul.f32 %v318_v18, %v2538_v28 }
 0x143   : > { %1547 = vrot.lane.b32.xlu0 %v1401_v48, %s2232_s28 }
 0x144   : > { %v306_v31 = vpop.permute.xlu1 %305  ;;  %v344_v28 = vpack.c.bf16 %v335_v37, %v335_v37 }
 0x145   : > { %v1089_v32 = vpop.permute.xlu0 %1088  ;;  %v319_v23 = vsel %vm317_vm12, %v2980_v15, %v306_v31 }
 0x146   : > { %1543 = vrot.lane.b32.xlu1 %v1395_v41, %s2232_s28  ;;  %v336_v49 = vmul.f32 %v319_v23, %v2562_v52 }
 0x147   : > { %1525 = vrot.lane.b32.xlu0 %v1368_v40, %s2232_s28 }
 0x148   : > { %v1044_v10 = vpop.permute.xlu1 %1043  ;;  %v345_v41 = vpack.c.bf16 %v336_v49, %v336_v49 }
 0x149   : > { %v308_v55 = vpop.permute.xlu0 %307  ;;  %v1059_v5 = vsel %vm1057_vm13, %v2986_v21, %v1044_v10  ;;  %v1060_v39 = vsel %vm1057_vm13, %v1044_v10, %v1046_v6 }
 0x14a   : > { %1545 = vrot.lane.b32.xlu1 %v1398_v25, %s2232_s28  ;;  %v320_v15 = vsel %vm317_vm12, %v306_v31, %v308_v55 }
 0x14b   : > { %1527 = vrot.lane.b32.xlu0 %v1371_v42, %s2232_s28  ;;  %v337_v52 = vmul.f32 %v2542_v33, %v320_v15  ;;  %v2245_v42 = vmov 0  }
 0x14c   : > { %v1087_v43 = vpop.permute.xlu1 %1086  ;;  %1711 = vmatprep.mubr.bf16.mxu0 %v2245_v42  ;;  %1754 = vmatprep.mubr.bf16.mxu1 %v2245_v42 }
 0x14d   : > { %v1104_v59 = vsel %vm405_vm6, %v1087_v43, %v1089_v32  ;;  %v1040_v60 = vpop.permute.xlu0 %1039  ;;  %2221 = vset.pattern.permute.xlu0 %v2245_v42 }
 0x14e   : > { %1523 = vrot.lane.b32.xlu1 %v1365_v17, %s2232_s28  ;;  %v1338_v61 = vsel %vm1305_vm8, %v1059_v5, %v1104_v59  ;;  %v1058_v1 = vsel %vm1057_vm13, %v1040_v60, %v2986_v21 }
 0x14f   : > { %1505 = vrot.lane.b32.xlu0 %v1338_v61, %s2232_s28 }
 0x150   : > { %v1091_v12 = vpop.permute.xlu1 %1090 }
 0x151   : > { %v3047_v29 = vpop.permute.xlu0 %1049  ;;  %v1105_v13 = vsel %vm405_vm6, %v1089_v32, %v1091_v12  ;;  %v334_v32 = vmul.f32 0.0, %v3001_v4  ;;  %v346_v4 = vpack.c.bf16 %v337_v52, %v337_v52 }
 0x152   : > { %1521 = vrot.lane.b32.xlu1 %v1362_v36, %s2232_s28  ;;  %v1341_v9 = vsel %vm1305_vm8, %v1060_v39, %v1105_v13 }
 0x153   : > { %v343_v33 = vpack.c.bf16 %v334_v32, %v334_v32 }
 0x154   : > { %v3057_v62 = vpop.permute.xlu1 %309 }
 0x155   : > { %v1093_v63 = vpop.permute.xlu0 %1092  ;;  %v321_v31 = vsel %vm317_vm12, %v308_v55, %v3057_v62 }
 0x156   : > { %1529 = vrot.lane.b32.xlu1 %v1374_v11, %s2232_s28  ;;  %v1106_v47 = vsel %vm405_vm6, %v1091_v12, %v1093_v63  ;;  %v338_v20 = vmul.f32 %v2572_v0, %v321_v31 }
 0x158   : > { %v1048_v51 = vpop.permute.xlu1 %1047  ;;  %v347_v0 = vpack.c.bf16 %v338_v20, %v338_v20 }
 0x159   : > { %v1006_v34 = vpop.permute.xlu0 %1005  ;;  %v1061_v53 = vsel %vm1057_vm13, %v1046_v6, %v1048_v51  ;;  %v1062_v21 = vsel %vm1057_vm13, %v1048_v51, %v3047_v29 }
 0x15a   : > { %1507 = vrot.lane.b32.xlu1 %v1341_v9, %s2232_s28  ;;  %v1344_v16 = vsel %vm1305_vm8, %v1061_v53, %v1106_v47 }
 0x15c   : > { %v1085_v50 = vpop.permute.xlu1 %1084 }
 0x15d   : > { %v1103_v27 = vsel %vm405_vm6, %v1085_v50, %v1087_v43  ;;  %v1010_v3 = vpop.permute.xlu0 %1009 }
 0x15e   : > { %1509 = vrot.lane.b32.xlu1 %v1344_v16, %s2232_s28  ;;  %v1335_v6 = vsel %vm1305_vm8, %v1058_v1, %v1103_v27 }
 0x15f   : > { %1503 = vrot.lane.b32.xlu0 %v1335_v6, %s2232_s28 }
 0x160   : > { %v3081_v48 = vpop.permute.xlu1 %1094 }
 0x161   : > { %v1107_v46 = vsel %vm405_vm6, %v1093_v63, %v3081_v48  ;;  %v1012_v26 = vpop.permute.xlu0 %1011 }
 0x162   : > { %v1347_v57 = vsel %vm1305_vm8, %v1062_v21, %v1107_v46  ;;  %v1025_v25 = vsel %vm581_vm5, %v1010_v3, %v1012_v26 }
 0x163   : > { %1511 = vrot.lane.b32.xlu0 %v1347_v57, %s2232_s28  ;;  %v1317_v59 = vsel %vm1305_vm8, %v346_v4, %v1025_v25 }
 0x164   : > { %v1008_v7 = vpop.permute.xlu1 %1007 }
 0x165   : > { %v1023_v40 = vsel %vm581_vm5, %v1006_v34, %v1008_v7  ;;  %v1024_v44 = vsel %vm581_vm5, %v1008_v7, %v1010_v3  ;;  %v1289_v38 = vpop.permute.xlu0 %1288 }
 0x166   : > { %v1311_v10 = vsel %vm1305_vm8, %v344_v28, %v1023_v40  ;;  %v1314_v14 = vsel %vm1305_vm8, %v345_v41, %v1024_v44  ;;  %v1301_v60 = vsel %vm1296_vm7, %v2861_v45, %v1289_v38 }
 0x167   : > { %1487 = vrot.lane.b32.xlu1 %v1311_v10, %s2232_s28  ;;  %1489 = vrot.lane.b32.xlu0 %v1314_v14, %s2232_s28  ;;  %v1426_v36 = vsel %vm1305_vm8, %v1301_v60, 1065369472 }
 0x168   : > { %v1004_v55 = vpop.permute.xlu1 %1003 }
 0x169   : > { %v1022_v30 = vsel %vm581_vm5, %v1004_v55, %v1006_v34  ;;  %v1293_v43 = vpop.permute.xlu0 %1292 }
 0x16a   : > { %v1308_v5 = vsel %vm1305_vm8, %v343_v33, %v1022_v30 }
 0x16b   : > { %1485 = vrot.lane.b32.xlu1 %v1308_v5, %s2232_s28  ;;  %1491 = vrot.lane.b32.xlu0 %v1317_v59, %s2232_s28 }
 0x16c   : > { %v3112_v17 = vpop.permute.xlu1 %1013 }
 0x16d   : > { %v1026_v61 = vsel %vm581_vm5, %v1012_v26, %v3112_v17  ;;  %v1208_v12 = vpop.permute.xlu0 %1207 }
 0x16e   : > { %v1320_v54 = vsel %vm1305_vm8, %v347_v0, %v1026_v61  ;;  %v1220_v9 = vsel %vm1215_vm10, %v2909_v58, %v1208_v12 }
 0x16f   : > { %1493 = vrot.lane.b32.xlu1 %v1320_v54, %s2232_s28  ;;  %1567 = vrot.lane.b32.xlu0 %v1426_v36, %s2232_s28 }
 0x170   : > { %v1291_v45 = vpop.permute.xlu1 %1290 }
 0x171   : > { %v1302_v56 = vsel %vm1296_vm7, %v1289_v38, %v1291_v45  ;;  %v1303_v63 = vsel %vm1296_vm7, %v1291_v45, %v1293_v43  ;;  %v1253_v11 = vpop.permute.xlu0 %1252 }
 0x172   : > { %v1428_v13 = vsel %vm1305_vm8, %v1302_v56, 1065369472  ;;  %v1430_v39 = vsel %vm1305_vm8, %v1303_v63, 1065369472  ;;  %v1265_v51 = vsel %vm1260_vm9, %v2925_v22, %v1253_v11 }
 0x173   : > { %1569 = vrot.lane.b32.xlu1 %v1428_v13, %s2232_s28  ;;  %1571 = vrot.lane.b32.xlu0 %v1430_v39, %s2232_s28  ;;  %v1404_v50 = vsel %vm1305_vm8, %v1220_v9, %v1265_v51  ;;  %v2223_v51 = vld [vmem:[%s2535_s11 + $0x20] sm:$0xff] }
 0x174   : > { %v1295_v34 = vpop.permute.xlu1 %1294 }
 0x175   : > { %v1304_v53 = vsel %vm1296_vm7, %v1293_v43, %v1295_v34  ;;  %v1212_v18 = vpop.permute.xlu0 %1211 }
 0x176   : > { %v1432_v47 = vsel %vm1305_vm8, %v1304_v53, 1065369472 }
 0x177   : > { %1573 = vrot.lane.b32.xlu1 %v1432_v47, %s2232_s28  ;;  %1549 = vrot.lane.b32.xlu0 %v1404_v50, %s2232_s28 }
 0x178   : > { %v1210_v22 = vpop.permute.xlu1 %1209 }
 0x179   : > { %v1257_v23 = vpop.permute.xlu0 %1256  ;;  %v1221_v27 = vsel %vm1215_vm10, %v1208_v12, %v1210_v22  ;;  %v1222_v3 = vsel %vm1215_vm10, %v1210_v22, %v1212_v18 }
 0x17c   : > { %v1255_v1 = vpop.permute.xlu1 %1254 }
 0x17d   : > { %v1266_v58 = vsel %vm1260_vm9, %v1253_v11, %v1255_v1  ;;  %v1267_v16 = vsel %vm1260_vm9, %v1255_v1, %v1257_v23  ;;  %v1130_v6 = vpop.permute.xlu0 %1129 }
 0x17e   : > { %v1407_v37 = vsel %vm1305_vm8, %v1221_v27, %v1266_v58  ;;  %v1410_v49 = vsel %vm1305_vm8, %v1222_v3, %v1267_v16  ;;  %v1140_v46 = vsel %vm317_vm12, %v2958_v35, %v1130_v6 }
 0x17f   : > { %1551 = vrot.lane.b32.xlu1 %v1407_v37, %s2232_s28  ;;  %1553 = vrot.lane.b32.xlu0 %v1410_v49, %s2232_s28 }
 0x180   : > { %v1214_v15 = vpop.permute.xlu1 %1213 }
 0x181   : > { %v1172_v21 = vpop.permute.xlu0 %1171  ;;  %v1223_v28 = vsel %vm1215_vm10, %v1212_v18, %v1214_v15  ;;  %v2246_v15 = vmov 65535  }
 0x182   : > { %v1184_v26 = vsel %vm1179_vm11, %v2966_v2, %v1172_v21 }
 0x183   : > { %v1377_v57 = vsel %vm1305_vm8, %v1140_v46, %v1184_v26 }
 0x184   : > { %v1259_v32 = vpop.permute.xlu1 %1258  ;;  %1531 = vrot.lane.b32.xlu0 %v1377_v57, %s2232_s28 }
 0x185   : > { %v1268_v41 = vsel %vm1260_vm9, %v1257_v23, %v1259_v32  ;;  %v1134_v52 = vpop.permute.xlu0 %1133 }
 0x186   : > { %v1413_v7 = vsel %vm1305_vm8, %v1223_v28, %v1268_v41 }
 0x187   : > { %1555 = vrot.lane.b32.xlu1 %v1413_v7, %s2232_s28 }
 0x188   : > { %v1132_v31 = vpop.permute.xlu1 %1131 }
 0x189   : > { %v1178_v40 = vpop.permute.xlu0 %1177  ;;  %v1141_v44 = vsel %vm317_vm12, %v1130_v6, %v1132_v31  ;;  %v1142_v25 = vsel %vm317_vm12, %v1132_v31, %v1134_v52 }
 0x18c   : > { %v1174_v35 = vpop.permute.xlu1 %1173 }
 0x18d   : > { %v1185_v2 = vsel %vm1179_vm11, %v1172_v21, %v1174_v35  ;;  %v314_v38 = vpop.permute.xlu0 %313  ;;  %v1653_v21 = vsel %vm1305_vm8, 4294967295, %v2246_v15 }
 0x18e   : > { %v1380_v10 = vsel %vm1305_vm8, %v1141_v44, %v1185_v2  ;;  %v3198_v57 = vsel %vm1652_vm14, %v1653_v21, 0 }
 0x18f   : > { %1533 = vrot.lane.b32.xlu1 %v1380_v10, %s2232_s28 }
 0x190   : > { %v1176_v14 = vpop.permute.xlu1 %1175 }
 0x191   : > { %v1186_v33 = vsel %vm1179_vm11, %v1174_v35, %v1176_v14  ;;  %v1187_v4 = vsel %vm1179_vm11, %v1176_v14, %v1178_v40  ;;  %v1054_v20 = vpop.permute.xlu0 %1053 }
 0x192   : > { %v1383_v55 = vsel %vm1305_vm8, %v1142_v25, %v1186_v33  ;;  %v1386_v30 = vsel %vm1305_vm8, %v1134_v52, %v1187_v4 }
 0x193   : > { %1535 = vrot.lane.b32.xlu0 %v1383_v55, %s2232_s28  ;;  %1537 = vrot.lane.b32.xlu1 %v1386_v30, %s2232_s28 }
 0x194   : > { %v312_v43 = vpop.permute.xlu1 %311 }
 0x195   : > { %v1099_v5 = vpop.permute.xlu0 %1098  ;;  %v323_v13 = vsel %vm317_vm12, %v312_v43, %v314_v38 }
 0x196   : > { %v340_v34 = vmul.f32 %v2768_v19, %v323_v13 }
 0x198   : > { %v1052_v59 = vpop.permute.xlu1 %1051  ;;  %v349_v27 = vpack.c.bf16 %v340_v34, %v340_v34 }
 0x199   : > { %v1056_v60 = vpop.permute.xlu0 %1055  ;;  %v1063_v61 = vsel %vm1057_vm13, %v3047_v29, %v1052_v59  ;;  %v1064_v12 = vsel %vm1057_vm13, %v1052_v59, %v1054_v20  ;;  %v322_v29 = vsel %vm317_vm12, %v3057_v62, %v312_v43 }
 0x19a   : > { %v1065_v53 = vsel %vm1057_vm13, %v1054_v20, %v1056_v60 }
 0x19c   : > { %v1097_v0 = vpop.permute.xlu1 %1096 }
 0x19d   : > { %v1108_v36 = vsel %vm405_vm6, %v3081_v48, %v1097_v0  ;;  %v1109_v54 = vsel %vm405_vm6, %v1097_v0, %v1099_v5  ;;  %v1016_v45 = vpop.permute.xlu0 %1015  ;;  %v339_v48 = vmul.f32 %v2223_v51, %v322_v29 }
 0x19e   : > { %v1350_v56 = vsel %vm1305_vm8, %v1063_v61, %v1108_v36  ;;  %v1353_v63 = vsel %vm1305_vm8, %v1064_v12, %v1109_v54  ;;  %v1027_v1 = vsel %vm581_vm5, %v3112_v17, %v1016_v45 }
 0x19f   : > { %1513 = vrot.lane.b32.xlu0 %v1350_v56, %s2232_s28  ;;  %1515 = vrot.lane.b32.xlu1 %v1353_v63, %s2232_s28  ;;  %v348_v19 = vpack.c.bf16 %v339_v48, %v339_v48 }
 0x1a0   : > { %v316_v11 = vpop.permute.xlu1 %315 }
 0x1a1   : > { %v1020_v39 = vpop.permute.xlu0 %1019  ;;  %v324_v18 = vsel %vm317_vm12, %v314_v38, %v316_v11  ;;  %v342_v23 = vmul.f32 %v2783_v24, %v316_v11  ;;  %v1323_v49 = vsel %vm1305_vm8, %v348_v19, %v1027_v1 }
 0x1a2   : > { %v341_v3 = vmul.f32 %v2803_v8, %v324_v18 }
 0x1a3   : > { %v351_v37 = vpack.c.bf16 %v342_v23, %v342_v23  ;;  %v3240_v23 = vld [vmem:[%s3328_s2] sm:$0xff]  }
 0x1a4   : > { %v1101_v9 = vpop.permute.xlu1 %1100  ;;  %v350_v8 = vpack.c.bf16 %v341_v3, %v341_v3 }
 0x1a5   : > { %v1110_v47 = vsel %vm405_vm6, %v1099_v5, %v1101_v9  ;;  %v1359_v50 = vsel %vm1305_vm8, %v1056_v60, %v1101_v9  ;;  %v1562_v22 = vpop.permute.xlu0 %1561  ;;  %v1332_v32 = vsel %vm1305_vm8, %v351_v37, %v1020_v39 }
 0x1a6   : > { %1519 = vrot.lane.b32.xlu1 %v1359_v50, %s2232_s28  ;;  %v1356_v62 = vsel %vm1305_vm8, %v1065_v53, %v1110_v47 }
 0x1a7   : > { %1517 = vrot.lane.b32.xlu0 %v1356_v62, %s2232_s28 }
 0x1a8   : > { %v1018_v58 = vpop.permute.xlu1 %1017 }
 0x1a9   : > { %v1028_v16 = vsel %vm581_vm5, %v1016_v45, %v1018_v58  ;;  %v1564_v6 = vpop.permute.xlu0 %1563  ;;  %v1029_v17 = vsel %vm581_vm5, %v1018_v58, %v1020_v39 }
 0x1aa   : > { %v1326_v24 = vsel %vm1305_vm8, %v349_v27, %v1028_v16  ;;  %v1329_v41 = vsel %vm1305_vm8, %v350_v8, %v1029_v17  ;;  %v1610_v35 = vsel %vm950_vm0, %v1562_v22, %v1564_v6 }
 0x1ab   : > { %1497 = vrot.lane.b32.xlu1 %v1326_v24, %s2232_s28  ;;  %1495 = vrot.lane.b32.xlu0 %v1323_v49, %s2232_s28  ;;  %v1662_v14 = vand.u32 %v3198_v57, %v1610_v35 }
 0x1ac   : > { %v1560_v46 = vpop.permute.xlu1 %1559 }
 0x1ad   : > { %v1609_v26 = vsel %vm950_vm0, %v1560_v46, %v1562_v22  ;;  %v1542_v28 = vpop.permute.xlu0 %1541 }
 0x1ae   : > { %v1659_v52 = vand.u32 %v3198_v57, %v1609_v26 }
 0x1af   : > { %1501 = vrot.lane.b32.xlu1 %v1332_v32, %s2232_s28  ;;  %1499 = vrot.lane.b32.xlu0 %v1329_v41, %s2232_s28 }
 0x1b0   : > { %v1558_v7 = vpop.permute.xlu1 %1557  ;;  %1685 = vmatprep.subr.bf16.mxu0 %v1659_v52 }
 0x1b1   : > { %v1608_v31 = vsel %vm950_vm0, %v1558_v7, %v1560_v46  ;;  %v1540_v44 = vpop.permute.xlu0 %1539 }
 0x1b2   : > { %v1656_v40 = vand.u32 %v3198_v57, %v1608_v31  ;;  %v1600_v20 = vsel %vm950_vm0, %v1540_v44, %v1542_v28 }
 0x1b4   : > { %v3208_v2 = vpop.permute.xlu1 %1565  ;;  %1686 = vmatpush1.bf16.msra.mxu0 %v1656_v40 }
 0x1b5   : > { %v1611_v38 = vsel %vm950_vm0, %v1564_v6, %v3208_v2  ;;  %v3215_v4 = vpop.permute.xlu0 %1547 }
 0x1b6   : > { %v1665_v10 = vand.u32 %v3198_v57, %v1611_v38 }
 0x1b8   : > { %v1544_v25 = vpop.permute.xlu1 %1543  ;;  %1728 = vmatprep.subr.bf16.mxu1 %v1665_v10 }
 0x1b9   : > { %1729 = vmatpush1.bf16.msra.mxu1 %v1662_v14  ;;  %v1601_v33 = vsel %vm950_vm0, %v1542_v28, %v1544_v25  ;;  %v1526_v5 = vpop.permute.xlu0 %1525 }
 0x1ba   : > { %1687 = vmatprep.subr.bf16.mxu0 %v1601_v33 }
 0x1bb   : > { %1688 = vmatpush1.bf16.msra.mxu0 %v1600_v20 }
 0x1bc   : > { %v1546_v55 = vpop.permute.xlu1 %1545 }
 0x1bd   : > { %v1603_v30 = vsel %vm950_vm0, %v1546_v55, %v3215_v4  ;;  %v1602_v43 = vsel %vm950_vm0, %v1544_v25, %v1546_v55  ;;  %v1528_v12 = vpop.permute.xlu0 %1527 }
 0x1be   : > { %1730 = vmatprep.subr.bf16.mxu1 %v1603_v30  ;;  %v1594_v45 = vsel %vm950_vm0, %v1526_v5, %v1528_v12 }
 0x1bf   : > { %1731 = vmatpush1.bf16.msra.mxu1 %v1602_v43 }
 0x1c0   : > { %v1524_v59 = vpop.permute.xlu1 %1523 }
 0x1c1   : > { %v1593_v60 = vsel %vm950_vm0, %v1524_v59, %v1526_v5  ;;  %v1506_v56 = vpop.permute.xlu0 %1505 }
 0x1c2   : > { %1689 = vmatprep.subr.bf16.mxu0 %v1593_v60 }
 0x1c4   : > { %v1522_v0 = vpop.permute.xlu1 %1521 }
 0x1c5   : > { %v1592_v61 = vsel %vm950_vm0, %v1522_v0, %v1524_v59 }
 0x1c6   : > { %1690 = vmatpush1.bf16.msra.mxu0 %v1592_v61 }
 0x1c8   : > { %v3223_v36 = vpop.permute.xlu1 %1529 }
 0x1c9   : > { %v1595_v54 = vsel %vm950_vm0, %v1528_v12, %v3223_v36 }
 0x1ca   : > { %1732 = vmatprep.subr.bf16.mxu1 %v1595_v54 }
 0x1cb   : > { %1733 = vmatpush1.bf16.msra.mxu1 %v1594_v45 }
 0x1cc   : > { %v1508_v63 = vpop.permute.xlu1 %1507 }
 0x1cd   : > { %v1585_v11 = vsel %vm950_vm0, %v1506_v56, %v1508_v63 }
 0x1ce   : > { %1691 = vmatprep.subr.bf16.mxu0 %v1585_v11 }
 0x1d0   : > { %v1510_v39 = vpop.permute.xlu1 %1509 }
 0x1d1   : > { %v1504_v29 = vpop.permute.xlu0 %1503  ;;  %v1586_v34 = vsel %vm950_vm0, %v1508_v63, %v1510_v39 }
 0x1d2   : > { %v1584_v13 = vsel %vm950_vm0, %v1504_v29, %v1506_v56  ;;  %v2043_v56 = vld [vmem:[%s3330_s4] sm:$0xff] }
 0x1d3   : > { %1692 = vmatpush1.bf16.msra.mxu0 %v1584_v13  ;;  %2050 = vperm.xlu0 %2221, %v2043_v56  }
 0x1d5   : > { %v3230_v51 = vpop.permute.xlu0 %1511 }
 0x1d6   : > { %v1587_v48 = vsel %vm950_vm0, %v1510_v39, %v3230_v51 }
 0x1d7   : > { %1734 = vmatprep.subr.bf16.mxu1 %v1587_v48 }
 0x1d8   : > { %1735 = vmatpush1.bf16.msra.mxu1 %v1586_v34 }
 0x1d9   : > { %v1488_v9 = vpop.permute.xlu1 %1487  ;;  %v1490_v53 = vpop.permute.xlu0 %1489 }
 0x1da   : > { %v1577_v18 = vsel %vm950_vm0, %v1488_v9, %v1490_v53 }
 0x1db   : > { %1693 = vmatprep.subr.bf16.mxu0 %v1577_v18 }
 0x1dd   : > { %v1486_v47 = vpop.permute.xlu1 %1485  ;;  %v1492_v50 = vpop.permute.xlu0 %1491 }
 0x1de   : > { %v1576_v22 = vsel %vm950_vm0, %v1486_v47, %v1488_v9  ;;  %v1578_v27 = vsel %vm950_vm0, %v1490_v53, %v1492_v50 }
 0x1df   : > { %1694 = vmatpush1.bf16.msra.mxu0 %v1576_v22 }
 0x1e1   : > { %v3242_v62 = vpop.permute.xlu1 %1493  ;;  %v1568_v1 = vpop.permute.xlu0 %1567 }
 0x1e2   : > { %v1579_v19 = vsel %vm950_vm0, %v1492_v50, %v3242_v62  ;;  %2174 = vmatmul.mubr.msk.bf16.vlgmr.msra.gmra.mxu0 %vm1648_vm15, %v3240_v23  ;;  %v1612_v3 = vsel %vm950_vm0, %v3208_v2, %v1568_v1 }
 0x1e3   : > { %1736 = vmatprep.subr.bf16.mxu1 %v1579_v19  ;;  %1797 = vmatprep.mubr.bf16.mxu0 %v2245_v42  ;;  %v1668_v24 = vand.u32 %v3198_v57, %v1612_v3 }
 0x1e4   : > { %1737 = vmatpush1.bf16.msra.mxu1 %v1578_v27  ;;  %v1875_v27 = vld [vmem:[%s3329_s3] sm:$0xf] }
 0x1e5   : > { %v1570_v58 = vpop.permute.xlu1 %1569  ;;  %v1572_v6 = vpop.permute.xlu0 %1571 }
 0x1e6   : > { %v1613_v16 = vsel %vm950_vm0, %v1568_v1, %v1570_v58  ;;  %v1614_v49 = vsel %vm950_vm0, %v1570_v58, %v1572_v6 }
 0x1e7   : > { %v1671_v37 = vand.u32 %v3198_v57, %v1613_v16  ;;  %2175 = vmatmul.mubr.msk.bf16.vlgmr.msra.gmra.mxu1 %vm1648_vm15, %v3240_v23  ;;  %v1674_v8 = vand.u32 %v3198_v57, %v1614_v49 }
 0x1e8   : > { %1840 = vmatprep.mubr.bf16.mxu1 %v2245_v42 }
 0x1e9   : > { %v1574_v15 = vpop.permute.xlu1 %1573  ;;  %1771 = vmatprep.subr.bf16.mxu0 %v1671_v37  ;;  %v1550_v46 = vpop.permute.xlu0 %1549 }
 0x1ea   : > { %v1615_v21 = vsel %vm950_vm0, %v1572_v6, %v1574_v15  ;;  %1772 = vmatpush1.bf16.msra.mxu0 %v1668_v24  ;;  %v1604_v28 = vsel %vm950_vm0, %v3215_v4, %v1550_v46 }
 0x1eb   : > { %v1677_v17 = vand.u32 %v3198_v57, %v1615_v21 }
 0x1ed   : > { %1814 = vmatprep.subr.bf16.mxu1 %v1677_v17 }
 0x1ee   : > { %1815 = vmatpush1.bf16.msra.mxu1 %v1674_v8 }
 0x1f1   : > { %v1552_v26 = vpop.permute.xlu1 %1551  ;;  %v1554_v41 = vpop.permute.xlu0 %1553 }
 0x1f2   : > { %v1605_v32 = vsel %vm950_vm0, %v1550_v46, %v1552_v26  ;;  %v1606_v31 = vsel %vm950_vm0, %v1552_v26, %v1554_v41 }
 0x1f3   : > { %1773 = vmatprep.subr.bf16.mxu0 %v1605_v32 }
 0x1f4   : > { %1774 = vmatpush1.bf16.msra.mxu0 %v1604_v28 }
 0x1f6   : > { %v1532_v57 = vpop.permute.xlu0 %1531 }
 0x1f7   : > { %v1596_v44 = vsel %vm950_vm0, %v3223_v36, %v1532_v57 }
 0x1f9   : > { %v1556_v52 = vpop.permute.xlu1 %1555 }
 0x1fa   : > { %v1607_v7 = vsel %vm950_vm0, %v1554_v41, %v1556_v52 }
 0x1fb   : > { %1816 = vmatprep.subr.bf16.mxu1 %v1607_v7 }
 0x1fc   : > { %1817 = vmatpush1.bf16.msra.mxu1 %v1606_v31 }
 0x201   : > { %v1534_v40 = vpop.permute.xlu1 %1533 }
 0x202   : > { %v1597_v35 = vsel %vm950_vm0, %v1532_v57, %v1534_v40 }
 0x203   : > { %1775 = vmatprep.subr.bf16.mxu0 %v1597_v35  ;;  %v2044_v35 = vld [vmem:[%s2535_s11] sm:$0xff] }
 0x204   : > { %1776 = vmatpush1.bf16.msra.mxu0 %v1596_v44 }
 0x205   : > { %v1538_v2 = vpop.permute.xlu1 %1537  ;;  %v1536_v38 = vpop.permute.xlu0 %1535 }
 0x206   : > { %v1598_v10 = vsel %vm950_vm0, %v1534_v40, %v1536_v38  ;;  %v1599_v14 = vsel %vm950_vm0, %v1536_v38, %v1538_v2  ;;  %v2045_v2 = vld [vmem:[%s2535_s11 + $0x8] sm:$0xff] }
 0x207   : > { %1818 = vmatprep.subr.bf16.mxu1 %v1599_v14 }
 0x208   : > { %1819 = vmatpush1.bf16.msra.mxu1 %v1598_v10 }
 0x211   : > { %v1516_v25 = vpop.permute.xlu1 %1515  ;;  %v1514_v33 = vpop.permute.xlu0 %1513 }
 0x212   : > { %v1588_v4 = vsel %vm950_vm0, %v3230_v51, %v1514_v33  ;;  %v1589_v20 = vsel %vm950_vm0, %v1514_v33, %v1516_v25 }
 0x213   : > { %1777 = vmatprep.subr.bf16.mxu0 %v1589_v20 }
 0x214   : > { %1778 = vmatpush1.bf16.msra.mxu0 %v1588_v4 }
 0x218   : > { %v1520_v55 = vpop.permute.xlu1 %1519 }
 0x219   : > { %v1518_v30 = vpop.permute.xlu0 %1517 }
 0x21a   : > { %v1590_v43 = vsel %vm950_vm0, %v1516_v25, %v1518_v30  ;;  %v1591_v5 = vsel %vm950_vm0, %v1518_v30, %v1520_v55  ;;  %v2182_v25 = vld [vmem:[%s2535_s11 + $0x10] sm:$0xff]  ;;  %v2183_v30 = vld [vmem:[%s2535_s11 + $0x18] sm:$0xff] }
 0x21b   : > { %1820 = vmatprep.subr.bf16.mxu1 %v1591_v5 }
 0x21c   : > { %1821 = vmatpush1.bf16.msra.mxu1 %v1590_v43 }
 0x21d   : > { %v1498_v59 = vpop.permute.xlu1 %1497  ;;  %v1496_v60 = vpop.permute.xlu0 %1495 }
 0x21e   : > { %v1580_v0 = vsel %vm950_vm0, %v3242_v62, %v1496_v60  ;;  %v1581_v61 = vsel %vm950_vm0, %v1496_v60, %v1498_v59 }
 0x21f   : > { %1779 = vmatprep.subr.bf16.mxu0 %v1581_v61 }
 0x220   : > { %1780 = vmatpush1.bf16.msra.mxu0 %v1580_v0 }
 0x221   : > { %v1502_v12 = vpop.permute.xlu1 %1501  ;;  %v1500_v36 = vpop.permute.xlu0 %1499 }
 0x222   : > { %v1582_v54 = vsel %vm950_vm0, %v1498_v59, %v1500_v36  ;;  %v1583_v45 = vsel %vm950_vm0, %v1500_v36, %v1502_v12 }
 0x223   : > { %2176 = vmatmul.mubr.msk.bf16.vlgmr.msra.gmra.mxu0 %vm1648_vm15, %v3240_v23  ;;  %1822 = vmatprep.subr.bf16.mxu1 %v1583_v45  ;;  %v2186_v45 = vld [vmem:[%s2535_s11 + $0x20] sm:$0xff] }
 0x224   : > { %1823 = vmatpush1.bf16.msra.mxu1 %v1582_v54  ;;  %1911 = vmatprep.mubr.bf16.mxu0 %v2245_v42 }
 0x227   : > { %2177 = vmatmul.mubr.msk.bf16.vlgmr.msra.gmra.mxu1 %vm1648_vm15, %v3240_v23 }
 0x228   : > { %1952 = vmatprep.mubr.bf16.mxu1 %v2245_v42 }
 0x24e   : > { %v2051_v38 = vpop.permute.xlu0 %2050 }
 0x2a2   : > { %v1713_v63 = vpop.f32.mrf.mxu0 }
 0x2a3   : > { %v1851_v29 = vmax.f32 %v1713_v63, 0.0  ;;  %v2187_v63 = vld [vmem:[%s2535_s11 + $0x28] sm:$0xff] }
 0x2a4   : > { %v1715_v11 = vpop.f32.mrf.mxu0 }
 0x2a5   : > { %v1852_v51 = vmax.f32 %v1715_v11, 0.0 }
 0x2a6   : > { %v1717_v13 = vpop.f32.mrf.mxu0 }
 0x2a7   : > { %v1756_v39 = vpop.f32.mrf.mxu1  ;;  %v1859_v48 = vmax.f32 %v1717_v13, 0.0  ;;  %v2190_v13 = vld [vmem:[%s2535_s11 + $0x30] sm:$0xff] }
 0x2a8   : > { %v1719_v34 = vpop.f32.mrf.mxu0  ;;  %v1853_v47 = vmax.f32 %v1756_v39, 0.0 }
 0x2a9   : > { %v1758_v9 = vpop.f32.mrf.mxu1  ;;  %v1860_v53 = vmax.f32 %v1719_v34, 0.0  ;;  %v1867_v18 = vpack.c.bf16 %v1859_v48, %v1851_v29 }
 0x2aa   : > { %v1854_v23 = vmax.f32 %v1758_v9, 0.0  ;;  %v2191_v9 = vld [vmem:[%s2535_s11 + $0x38] sm:$0xff] }
 0x2ab   : > { %v1760_v50 = vpop.f32.mrf.mxu1  ;;  %v1868_v22 = vpack.c.bf16 %v1860_v53, %v1852_v51 }
 0x2ac   : > { %v1861_v62 = vmax.f32 %v1760_v50, 0.0 }
 0x2ad   : > { %v1762_v1 = vpop.f32.mrf.mxu1  ;;  %1893 = vmatprep.subr.bf16.mxu0 %v1868_v22 }
 0x2ae   : > { %v1862_v19 = vmax.f32 %v1762_v1, 0.0  ;;  %1894 = vmatpush1.bf16.msra.mxu0 %v1867_v18  ;;  %v1869_v3 = vpack.c.bf16 %v1861_v62, %v1853_v47 }
 0x2b0   : > { %v1870_v58 = vpack.c.bf16 %v1862_v19, %v1854_v23 }
 0x2b1   : > { %2178 = vmatmul.mubr.msk.bf16.vlgmr.msra.gmra.mxu0 %vm862_vm1, %v1875_v27 }
 0x2b2   : > { %1934 = vmatprep.subr.bf16.mxu1 %v1870_v58  ;;  %1993 = vmatprep.mubr.bf16.mxu0 %v2245_v42 }
 0x2b3   : > { %1935 = vmatpush1.bf16.msra.mxu1 %v1869_v3 }
 0x2b6   : > { %2179 = vmatmul.mubr.msk.bf16.vlgmr.msra.gmra.mxu1 %vm862_vm1, %v1875_v27 }
 0x2b7   : > { %2034 = vmatprep.mubr.bf16.mxu1 %v2245_v42 }
 0x2e3   : > { %v1799_v16 = vpop.f32.mrf.mxu0 }
 0x2e4   : > { %v1855_v49 = vmax.f32 %v1799_v16, 0.0 }
 0x2e5   : > { %v1801_v6 = vpop.f32.mrf.mxu0 }
 0x2e6   : > { %v1856_v8 = vmax.f32 %v1801_v6, 0.0 }
 0x2e7   : > { %v1803_v37 = vpop.f32.mrf.mxu0  ;;  %v1842_v24 = vpop.f32.mrf.mxu1 }
 0x2e8   : > { %v1863_v15 = vmax.f32 %v1803_v37, 0.0  ;;  %v1857_v42 = vmax.f32 %v1842_v24, 0.0 }
 0x2e9   : > { %v1805_v21 = vpop.f32.mrf.mxu0  ;;  %v1844_v17 = vpop.f32.mrf.mxu1 }
 0x2ea   : > { %v1864_v46 = vmax.f32 %v1805_v21, 0.0  ;;  %v1871_v28 = vpack.c.bf16 %v1863_v15, %v1855_v49  ;;  %v1858_v7 = vmax.f32 %v1844_v17, 0.0 }
 0x2eb   : > { %v1846_v26 = vpop.f32.mrf.mxu1 }
 0x2ec   : > { %v1872_v32 = vpack.c.bf16 %v1864_v46, %v1856_v8  ;;  %v1865_v41 = vmax.f32 %v1846_v26, 0.0 }
 0x2ed   : > { %v1848_v52 = vpop.f32.mrf.mxu1 }
 0x2ee   : > { %v1866_v31 = vmax.f32 %v1848_v52, 0.0  ;;  %1975 = vmatprep.subr.bf16.mxu0 %v1872_v32  ;;  %v1873_v40 = vpack.c.bf16 %v1865_v41, %v1857_v42 }
 0x2ef   : > { %1976 = vmatpush1.bf16.msra.mxu0 %v1871_v28 }
 0x2f0   : > { %v1874_v57 = vpack.c.bf16 %v1866_v31, %v1858_v7 }
 0x2f2   : > { %2016 = vmatprep.subr.bf16.mxu1 %v1874_v57  ;;  %2180 = vmatmul.mubr.msk.bf16.vlgmr.msra.gmra.mxu0 %vm862_vm1, %v1875_v27 }
 0x2f3   : > { %2017 = vmatpush1.bf16.msra.mxu1 %v1873_v40 }
 0x2f6   : > { %2181 = vmatmul.mubr.msk.bf16.vlgmr.msra.gmra.mxu1 %vm862_vm1, %v1875_v27 }
 0x371   : > { %v1913_v44 = vpop.f32.mrf.mxu0 }
 0x372   : > { %v2046_v10 = vmul.f32 %v2044_v35, %v1913_v44 }
 0x373   : > { %v1915_v14 = vpop.f32.mrf.mxu0 }
 0x374   : > { %v2047_v33 = vmul.f32 %v2045_v2, %v1915_v14  ;;  %v2053_v4 = vadd.f32 %v2051_v38, %v2046_v10 }
 0x375   : > { %v1917_v20 = vpop.f32.mrf.mxu0 }
 0x376   : > { %v1954_v55 = vpop.f32.mrf.mxu1  ;;  %v2054_v43 = vadd.f32 %v2051_v38, %v2047_v33  ;;  %2055 = vst [vmem:[%s3307_s8] sm:$0xff] %v2053_v4 }
 0x377   : > { %v2059_v5 = vmul.f32 %v2182_v25, %v1954_v55  ;;  %v1918_v59 = vpop.f32.mrf.mxu0 }
 0x378   : > { %v1956_v60 = vpop.f32.mrf.mxu1  ;;  %2056 = vst [vmem:[%s3307_s8 + $0x8] sm:$0xff] %v2054_v43 }
 0x379   : > { %v2060_v0 = vmul.f32 %v2183_v30, %v1956_v60  ;;  %v2061_v61 = vadd.f32 %v2059_v5, %v2051_v38 }
 0x37a   : > { %v1958_v12 = vpop.f32.mrf.mxu1 }
 0x37b   : > { %v2062_v36 = vadd.f32 %v2060_v0, %v2051_v38  ;;  %2184 = vst [vmem:[%s3307_s8 + $0x10] sm:$0xff] %v2061_v61 }
 0x37c   : > { %v1959_v54 = vpop.f32.mrf.mxu1 }
 0x37d   : > { %2185 = vst [vmem:[%s3307_s8 + $0x18] sm:$0xff] %v2062_v36 }
 0x3b2   : > { %v1995_v56 = vpop.f32.mrf.mxu0 }
 0x3b3   : > { %v2068_v11 = vmul.f32 %v2186_v45, %v1995_v56 }
 0x3b4   : > { %v1997_v29 = vpop.f32.mrf.mxu0 }
 0x3b5   : > { %v2069_v39 = vmul.f32 %v2187_v63, %v1997_v29  ;;  %v2070_v51 = vadd.f32 %v2068_v11, %v2051_v38 }
 0x3b6   : > { %v2036_v48 = vpop.f32.mrf.mxu1  ;;  %v1999_v34 = vpop.f32.mrf.mxu0 }
 0x3b7   : > { %v2071_v53 = vadd.f32 %v2069_v39, %v2051_v38  ;;  %2188 = vst [vmem:[%s3307_s8 + $0x20] sm:$0xff] %v2070_v51  ;;  %v2077_v18 = vmul.f32 %v2190_v13, %v2036_v48 }
 0x3b8   : > { %v2038_v47 = vpop.f32.mrf.mxu1  ;;  %v2000_v50 = vpop.f32.mrf.mxu0 }
 0x3b9   : > { %2189 = vst [vmem:[%s3307_s8 + $0x28] sm:$0xff] %v2071_v53  ;;  %v2079_v22 = vadd.f32 %v2077_v18, %v2051_v38  ;;  %v2078_v23 = vmul.f32 %v2191_v9, %v2038_v47 }
 0x3ba   : > { %v2040_v62 = vpop.f32.mrf.mxu1 }
 0x3bb   : > { %2192 = vst [vmem:[%s3307_s8 + $0x30] sm:$0xff] %v2079_v22  ;;  %v2080_v1 = vadd.f32 %v2078_v23, %v2051_v38 }
 0x3bc   : > { %v2041_v19 = vpop.f32.mrf.mxu1 }
 0x3bd   : > { %2193 = vst [vmem:[%s3307_s8 + $0x38] sm:$0xff] %v2080_v1 }
 0x3be PF: > { %s15_s18 = sadd.s32 1, %s2230_s18  }
 0x3bf   : > { %p12_p4 = scmp.ge.s32.totalorder %s15_s18, 4  }
 0x3c1   :  { %14 = sbr.rel (!%p12_p4) target bundleno = 1 (0x1), region = 83 }

</bundles_post_ra>
